<compile_context>
chip_gen: v6e
topology: v6e:2x2x1
jax: 0.10.0
libtpu: 0.0.40
codegen_flags: <defaults>
</compile_context>

<pallas_src>
import jax
import jax.numpy as jnp
from jax.experimental import pallas as pl
from jax.experimental.pallas import tpu as pltpu


def _round_up(n, m):
    return ((n + m - 1) // m) * m


def _vmem_capacity_bytes():
    try:
        return int(pltpu.get_tpu_info().vmem_capacity_bytes)
    except Exception:
        return 64 << 20  # conservative (v7x per-TensorCore VMEM)


def mlp_kernel(x_ref, w1_ref, b1_ref, w2_ref, b2_ref, o_ref, acc_ref):
    k = pl.program_id(1)

    @pl.when(k == 0)
    def _():
        acc_ref[...] = jnp.zeros_like(acc_ref)

    # hidden = relu(x @ W1[:, hk] + b1[hk]): bf16 operands into the MXU with
    # f32 accumulation; bias add / ReLU stay in f32 on the VPU (v5e has no
    # bf16 VPU path).
    h = jnp.dot(x_ref[...], w1_ref[...], preferred_element_type=jnp.float32)
    h = jnp.maximum(h + b1_ref[...], 0.0)
    # Dropout(p=0.1): identity at inference time (eval mode).
    # TODO(synk): training-mode dropout would need pltpu.prng_seed /
    #             prng_random_bits masking + 1/(1-p) scaling per grid step.
    acc_ref[...] += jnp.dot(h.astype(w2_ref.dtype), w2_ref[...],
                            preferred_element_type=jnp.float32)

    @pl.when(k == pl.num_programs(1) - 1)
    def _():
        o_ref[...] = (acc_ref[...] + b2_ref[...]).astype(o_ref.dtype)


def prepare_params(w1, b1, w2, b2, *, compute_dtype=jnp.bfloat16):
    """Pad feature dims to 128-lane multiples and cast ONCE (not per call).

    w1: [D_in, H], b1: [1, H] or [H], w2: [H, D_out], b2: [1, D_out] or [D_out].
    """
    D_in, H = w1.shape
    D_out = w2.shape[1]
    D_in_p, H_p, D_out_p = (_round_up(d, 128) for d in (D_in, H, D_out))
    cd = compute_dtype
    w1p = jnp.pad(w1.astype(cd), ((0, D_in_p - D_in), (0, H_p - H)))
    b1p = jnp.pad(jnp.reshape(b1, (1, H)).astype(jnp.float32),
                  ((0, 0), (0, H_p - H)))
    w2p = jnp.pad(w2.astype(cd), ((0, H_p - H), (0, D_out_p - D_out)))
    b2p = jnp.pad(jnp.reshape(b2, (1, D_out)).astype(jnp.float32),
                  ((0, 0), (0, D_out_p - D_out)))
    return dict(w1=w1p, b1=b1p, w2=w2p, b2=b2p,
                dims=(D_in, H, D_out), compute_dtype=cd)


def _choose_block_h(H_p, D_in_p, D_out_p, bb, cb, budget):
    # Resident weights (single k step, single-buffered) if they fit.
    resident = (D_in_p + D_out_p) * H_p * cb + H_p * 4 + bb * H_p * 4
    if resident <= budget:
        return H_p
    # Otherwise stream double-buffered H chunks; largest multiple of 128 that
    # divides H_p and fits the budget.
    per_lane = 2 * ((D_in_p + D_out_p) * cb + 4) + bb * 4
    target = max(128, (budget // max(per_lane, 1)) // 128 * 128)
    bh = min(H_p, target)
    while H_p % bh:
        bh -= 128
    return max(bh, 128)


def mlp_forward(x, params, *, block_b=256, block_h=None, out_dtype=None):
    """x: [B, D_in] -> [B, D_out] using padded params from prepare_params."""
    w1p, b1p, w2p, b2p = params["w1"], params["b1"], params["w2"], params["b2"]
    D_in, H, D_out = params["dims"]
    cd = params["compute_dtype"]
    D_in_p, H_p = w1p.shape
    D_out_p = w2p.shape[1]
    B = x.shape[0]
    out_dtype = out_dtype or x.dtype

    # Batch tile: large (fills MXU M dim, amortizes ~0.35us/step overhead) but
    # clamped to the sublane-rounded batch; always a multiple of 8.
    bb = max(8, min(_round_up(block_b, 8), _round_up(B, 8)))
    B_p = _round_up(B, bb)

    cb = jnp.dtype(cd).itemsize
    ob = jnp.dtype(out_dtype).itemsize
    vmem_cap = _vmem_capacity_bytes()

    if block_h is None:
        fixed = (2 * bb * D_in_p * cb + 2 * bb * D_out_p * ob
                 + bb * D_out_p * 4 + D_out_p * 4)
        budget = max(vmem_cap * 3 // 5 - fixed, 1 << 20)
        bh = _choose_block_h(H_p, D_in_p, D_out_p, bb, cb, budget)
    else:
        bh = block_h
    assert H_p % bh == 0
    num_h = H_p // bh

    # x is per-call data: pad batch / feature dims (zero rows sliced off below).
    xp = jnp.pad(x.astype(cd), ((0, B_p - B), (0, D_in_p - D_in)))

    grid = (B_p // bb, num_h)

    # Constant-index (resident) weight blocks: single-buffer to halve VMEM.
    # Streamed H chunks keep default double buffering.
    w_mode = pl.Buffered(1) if num_h == 1 else None

    w_bufs = 1 if num_h == 1 else 2
    footprint = (
        2 * bb * D_in_p * cb                              # x tiles (double-buffered)
        + 2 * bb * D_out_p * ob                           # out tiles (double-buffered)
        + w_bufs * ((D_in_p + D_out_p) * bh * cb + bh * 4)  # W1/W2/b1 chunks
        + D_out_p * 4                                     # b2
        + bb * D_out_p * 4                                # f32 accumulator scratch
        + bb * bh * 4                                     # f32 hidden temporary
    )
    vmem_limit = min(max(int(1.5 * footprint) + (2 << 20), 32 << 20),
                     vmem_cap - (4 << 20))

    def _spec(shape, index_map, mode):
        if mode is None:
            return pl.BlockSpec(shape, index_map)
        return pl.BlockSpec(shape, index_map, pipeline_mode=mode)

    def _build(mode):
        return pl.pallas_call(
            mlp_kernel,
            out_shape=jax.ShapeDtypeStruct((B_p, D_out_p), out_dtype),
            grid_spec=pltpu.PrefetchScalarGridSpec(
                num_scalar_prefetch=0,
                grid=grid,
                in_specs=[
                    # TODO(synk): bump to pipeline_mode=pl.Buffered(3) if
                    # profiling shows the x DMA exposed in a mem-bound regime.
                    pl.BlockSpec((bb, D_in_p), lambda i, k: (i, 0)),
                    _spec((D_in_p, bh), lambda i, k: (0, k), mode),
                    _spec((1, bh), lambda i, k: (0, k), mode),
                    _spec((bh, D_out_p), lambda i, k: (k, 0), mode),
                    _spec((1, D_out_p), lambda i, k: (0, 0), mode),
                ],
                out_specs=pl.BlockSpec((bb, D_out_p), lambda i, k: (i, 0)),
                scratch_shapes=[pltpu.VMEM((bb, D_out_p), jnp.float32)],
            ),
            compiler_params=pltpu.CompilerParams(
                dimension_semantics=("parallel", "arbitrary"),
                vmem_limit_bytes=int(vmem_limit)),
        )

    try:
        out_p = _build(w_mode)(xp, w1p, b1p, w2p, b2p)
    except Exception:
        # Fallback if this JAX build rejects pipeline_mode on BlockSpec.
        out_p = _build(None)(xp, w1p, b1p, w2p, b2p)

    return out_p[:B, :D_out]


def init_params(key, input_dim, hid_dim, output_dim, dtype=jnp.float32):
    # Deterministic init mimicking nn.Linear's uniform(-1/sqrt(fan_in), 1/sqrt(fan_in)).
    k1, k2, k3, k4 = jax.random.split(key, 4)
    lim1 = 1.0 / (input_dim ** 0.5)
    lim2 = 1.0 / (hid_dim ** 0.5)
    # Stored pre-transposed: [in_features, out_features].
    w1 = jax.random.uniform(k1, (input_dim, hid_dim), dtype, -lim1, lim1)
    b1 = jax.random.uniform(k2, (1, hid_dim), dtype, -lim1, lim1)
    w2 = jax.random.uniform(k3, (hid_dim, output_dim), dtype, -lim2, lim2)
    b2 = jax.random.uniform(k4, (1, output_dim), dtype, -lim2, lim2)
    return w1, b1, w2, b2


if __name__ == "__main__":
    key = jax.random.PRNGKey(0)
    # Small MLP dims consistent with the module; batch chosen so the batch grid
    # axis has >= 2 "parallel" steps (512 / block_b=256 -> grid=(2, 1)).
    batch, input_dim, hid_dim, output_dim = 512, 32, 64, 16

    kx, kp = jax.random.split(key)
    x = jax.random.normal(kx, (batch, input_dim), jnp.float32)
    w1, b1, w2, b2 = init_params(kp, input_dim, hid_dim, output_dim)

    params = prepare_params(w1, b1, w2, b2)          # pad + cast once
    out = mlp_forward(x, params, block_b=256)
    out = jax.block_until_ready(out)

    # Reference check in plain JAX (f32); loose tolerance for the bf16 matmuls.
    ref = jnp.maximum(x @ w1 + b1, 0.0) @ w2 + b2
    assert out.shape == (batch, output_dim)
    assert out.dtype == x.dtype
    assert jnp.allclose(out, ref, atol=5e-2, rtol=5e-2), (
        float(jnp.max(jnp.abs(out - ref))))

    print("KERNEL_OK")
</pallas_src>

<mosaic_0001>
module attributes {stable_mosaic.version = 11 : i64} {
  func.func @mlp_kernel(%arg0: i32, %arg1: i32, %arg2: memref<256x128xbf16, #tpu.memory_space<vmem>>, %arg3: memref<128x128xbf16, #tpu.memory_space<vmem>>, %arg4: memref<1x128xf32, #tpu.memory_space<vmem>>, %arg5: memref<128x128xbf16, #tpu.memory_space<vmem>>, %arg6: memref<1x128xf32, #tpu.memory_space<vmem>>, %arg7: memref<256x128xf32, #tpu.memory_space<vmem>>, %arg8: memref<256x128xf32, #tpu.memory_space<vmem>>) attributes {dimension_semantics = [#tpu.dimension_semantics<parallel>, #tpu.dimension_semantics<arbitrary>], iteration_bounds = array<i64: 2, 1>, scalar_prefetch = 0 : i64, scratch_operands = 1 : i64, tpu.core_type = #tpu.core_type<tc>, window_params = [{transform_indices = @transform_0, window_bounds = array<i64: 256, 128>}, {pipeline_mode = #tpu.pipeline_mode<synchronous>, transform_indices = @transform_1, window_bounds = array<i64: 128, 128>}, {pipeline_mode = #tpu.pipeline_mode<synchronous>, transform_indices = @transform_2, window_bounds = array<i64: 1, 128>}, {pipeline_mode = #tpu.pipeline_mode<synchronous>, transform_indices = @transform_3, window_bounds = array<i64: 128, 128>}, {pipeline_mode = #tpu.pipeline_mode<synchronous>, transform_indices = @transform_4, window_bounds = array<i64: 1, 128>}, {transform_indices = @transform_5, window_bounds = array<i64: 256, 128>}]} {
    %c0_i32 = arith.constant 0 : i32
    %0 = arith.cmpi eq, %arg1, %c0_i32 : i32
    %1 = arith.extui %0 : i1 to i32
    %c0_i32_0 = arith.constant 0 : i32
    %2 = arith.cmpi ne, %1, %c0_i32_0 : i32
    scf.if %2 {
      %cst_16 = arith.constant 0.000000e+00 : f32
      %20 = vector.broadcast %cst_16 : f32 to vector<256x128xf32>
      %c0_17 = arith.constant 0 : index
      %c0_18 = arith.constant 0 : index
      %21 = vector.load %arg8[%c0_17, %c0_18] : memref<256x128xf32, #tpu.memory_space<vmem>>, vector<256x128xf32>
      tpu.vector_store %arg8[%c0_17, %c0_18], %20 {strides = array<i32>} : memref<256x128xf32, #tpu.memory_space<vmem>>, vector<256x128xf32>,
    } else {
    }
    %c0 = arith.constant 0 : index
    %c0_1 = arith.constant 0 : index
    %3 = vector.load %arg2[%c0, %c0_1] : memref<256x128xbf16, #tpu.memory_space<vmem>>, vector<256x128xbf16>
    %c0_2 = arith.constant 0 : index
    %c0_3 = arith.constant 0 : index
    %4 = vector.load %arg3[%c0_2, %c0_3] : memref<128x128xbf16, #tpu.memory_space<vmem>>, vector<128x128xbf16>
    %cst = arith.constant dense<0.000000e+00> : vector<256x128xf32>
    %5 = tpu.matmul %3, %4, %cst {dimension_numbers = #tpu.dot_dimension_numbers<[1], [0], [0], [1], [0, 0, 1, 1], [], []>} : vector<256x128xbf16>, vector<128x128xbf16>, vector<256x128xf32> -> vector<256x128xf32>
    %c0_4 = arith.constant 0 : index
    %c0_5 = arith.constant 0 : index
    %6 = vector.load %arg4[%c0_4, %c0_5] : memref<1x128xf32, #tpu.memory_space<vmem>>, vector<1x128xf32>
    %7 = vector.broadcast %6 : vector<1x128xf32> to vector<256x128xf32>
    %8 = arith.addf %5, %7 : vector<256x128xf32>
    %cst_6 = arith.constant 0.000000e+00 : f32
    %9 = vector.broadcast %cst_6 : f32 to vector<256x128xf32>
    %10 = arith.maximumf %8, %9 : vector<256x128xf32>
    %c0_7 = arith.constant 0 : index
    %c0_8 = arith.constant 0 : index
    %11 = vector.load %arg8[%c0_7, %c0_8] : memref<256x128xf32, #tpu.memory_space<vmem>>, vector<256x128xf32>
    %12 = arith.truncf %10 : vector<256x128xf32> to vector<256x128xbf16>
    %c0_9 = arith.constant 0 : index
    %c0_10 = arith.constant 0 : index
    %13 = vector.load %arg5[%c0_9, %c0_10] : memref<128x128xbf16, #tpu.memory_space<vmem>>, vector<128x128xbf16>
    %cst_11 = arith.constant dense<0.000000e+00> : vector<256x128xf32>
    %14 = tpu.matmul %12, %13, %cst_11 {dimension_numbers = #tpu.dot_dimension_numbers<[1], [0], [0], [1], [0, 0, 1, 1], [], []>} : vector<256x128xbf16>, vector<128x128xbf16>, vector<256x128xf32> -> vector<256x128xf32>
    %15 = arith.addf %11, %14 : vector<256x128xf32>
    %c0_12 = arith.constant 0 : index
    %c0_13 = arith.constant 0 : index
    %16 = vector.load %arg8[%c0_12, %c0_13] : memref<256x128xf32, #tpu.memory_space<vmem>>, vector<256x128xf32>
    tpu.vector_store %arg8[%c0_12, %c0_13], %15 {strides = array<i32>} : memref<256x128xf32, #tpu.memory_space<vmem>>, vector<256x128xf32>,
    %c0_i32_14 = arith.constant 0 : i32
    %17 = arith.cmpi eq, %arg1, %c0_i32_14 : i32
    %18 = arith.extui %17 : i1 to i32
    %c0_i32_15 = arith.constant 0 : i32
    %19 = arith.cmpi ne, %18, %c0_i32_15 : i32
    scf.if %19 {
      %c0_16 = arith.constant 0 : index
      %c0_17 = arith.constant 0 : index
      %20 = vector.load %arg8[%c0_16, %c0_17] : memref<256x128xf32, #tpu.memory_space<vmem>>, vector<256x128xf32>
      %c0_18 = arith.constant 0 : index
      %c0_19 = arith.constant 0 : index
      %21 = vector.load %arg6[%c0_18, %c0_19] : memref<1x128xf32, #tpu.memory_space<vmem>>, vector<1x128xf32>
      %22 = vector.broadcast %21 : vector<1x128xf32> to vector<256x128xf32>
      %23 = arith.addf %20, %22 : vector<256x128xf32>
      %c0_20 = arith.constant 0 : index
      %c0_21 = arith.constant 0 : index
      %24 = vector.load %arg7[%c0_20, %c0_21] : memref<256x128xf32, #tpu.memory_space<vmem>>, vector<256x128xf32>
      tpu.vector_store %arg7[%c0_20, %c0_21], %23 {strides = array<i32>} : memref<256x128xf32, #tpu.memory_space<vmem>>, vector<256x128xf32>,
    } else {
    }
    return
  }
  func.func @transform_0(%arg0: i32, %arg1: i32) -> (i32, i32) {
    %c0_i32 = arith.constant 0 : i32
    %c0_i32_0 = arith.constant 0 : i32
    return %arg0, %c0_i32 : i32, i32
  }
  func.func @transform_1(%arg0: i32, %arg1: i32) -> (i32, i32) {
    %c0_i32 = arith.constant 0 : i32
    %c0_i32_0 = arith.constant 0 : i32
    return %c0_i32, %arg1 : i32, i32
  }
  func.func @transform_2(%arg0: i32, %arg1: i32) -> (i32, i32) {
    %c0_i32 = arith.constant 0 : i32
    %c0_i32_0 = arith.constant 0 : i32
    return %c0_i32, %arg1 : i32, i32
  }
  func.func @transform_3(%arg0: i32, %arg1: i32) -> (i32, i32) {
    %c0_i32 = arith.constant 0 : i32
    %c0_i32_0 = arith.constant 0 : i32
    return %arg1, %c0_i32 : i32, i32
  }
  func.func @transform_4(%arg0: i32, %arg1: i32) -> (i32, i32) {
    %c0_i32 = arith.constant 0 : i32
    %c0_i32_0 = arith.constant 0 : i32
    %c0_i32_1 = arith.constant 0 : i32
    return %c0_i32, %c0_i32_0 : i32, i32
  }
  func.func @transform_5(%arg0: i32, %arg1: i32) -> (i32, i32) {
    %c0_i32 = arith.constant 0 : i32
    %c0_i32_0 = arith.constant 0 : i32
    return %arg0, %c0_i32 : i32, i32
  }
}

module attributes {stable_mosaic.version = 11 : i64} {
  func.func @mlp_kernel(%arg0: i32, %arg1: i32, %arg2: memref<256x128xbf16, #tpu.memory_space<vmem>>, %arg3: memref<128x128xbf16, #tpu.memory_space<vmem>>, %arg4: memref<1x128xf32, #tpu.memory_space<vmem>>, %arg5: memref<128x128xbf16, #tpu.memory_space<vmem>>, %arg6: memref<1x128xf32, #tpu.memory_space<vmem>>, %arg7: memref<256x128xf32, #tpu.memory_space<vmem>>, %arg8: memref<256x128xf32, #tpu.memory_space<vmem>>) attributes {dimension_semantics = [#tpu.dimension_semantics<parallel>, #tpu.dimension_semantics<arbitrary>], iteration_bounds = array<i64: 2, 1>, scalar_prefetch = 0 : i64, scratch_operands = 1 : i64, tpu.core_type = #tpu.core_type<tc>, window_params = [{transform_indices = @transform_0, window_bounds = array<i64: 256, 128>}, {transform_indices = @transform_1, window_bounds = array<i64: 128, 128>}, {transform_indices = @transform_2, window_bounds = array<i64: 1, 128>}, {transform_indices = @transform_3, window_bounds = array<i64: 128, 128>}, {pipeline_mode = #tpu.pipeline_mode<synchronous>, transform_indices = @transform_4, window_bounds = array<i64: 1, 128>}, {transform_indices = @transform_5, window_bounds = array<i64: 256, 128>}]} {
    %c0_i32 = arith.constant 0 : i32
    %0 = arith.cmpi eq, %arg1, %c0_i32 : i32
    %1 = arith.extui %0 : i1 to i32
    %c0_i32_0 = arith.constant 0 : i32
    %2 = arith.cmpi ne, %1, %c0_i32_0 : i32
    scf.if %2 {
      %cst_16 = arith.constant 0.000000e+00 : f32
      %20 = vector.broadcast %cst_16 : f32 to vector<256x128xf32>
      %c0_17 = arith.constant 0 : index
      %c0_18 = arith.constant 0 : index
      %21 = vector.load %arg8[%c0_17, %c0_18] : memref<256x128xf32, #tpu.memory_space<vmem>>, vector<256x128xf32>
      tpu.vector_store %arg8[%c0_17, %c0_18], %20 {strides = array<i32>} : memref<256x128xf32, #tpu.memory_space<vmem>>, vector<256x128xf32>,
    } else {
    }
    %c0 = arith.constant 0 : index
    %c0_1 = arith.constant 0 : index
    %3 = vector.load %arg2[%c0, %c0_1] : memref<256x128xbf16, #tpu.memory_space<vmem>>, vector<256x128xbf16>
    %c0_2 = arith.constant 0 : index
    %c0_3 = arith.constant 0 : index
    %4 = vector.load %arg3[%c0_2, %c0_3] : memref<128x128xbf16, #tpu.memory_space<vmem>>, vector<128x128xbf16>
    %cst = arith.constant dense<0.000000e+00> : vector<256x128xf32>
    %5 = tpu.matmul %3, %4, %cst {dimension_numbers = #tpu.dot_dimension_numbers<[1], [0], [0], [1], [0, 0, 1, 1], [], []>} : vector<256x128xbf16>, vector<128x128xbf16>, vector<256x128xf32> -> vector<256x128xf32>
    %c0_4 = arith.constant 0 : index
    %c0_5 = arith.constant 0 : index
    %6 = vector.load %arg4[%c0_4, %c0_5] : memref<1x128xf32, #tpu.memory_space<vmem>>, vector<1x128xf32>
    %7 = vector.broadcast %6 : vector<1x128xf32> to vector<256x128xf32>
    %8 = arith.addf %5, %7 : vector<256x128xf32>
    %cst_6 = arith.constant 0.000000e+00 : f32
    %9 = vector.broadcast %cst_6 : f32 to vector<256x128xf32>
    %10 = arith.maximumf %8, %9 : vector<256x128xf32>
    %c0_7 = arith.constant 0 : index
    %c0_8 = arith.constant 0 : index
    %11 = vector.load %arg8[%c0_7, %c0_8] : memref<256x128xf32, #tpu.memory_space<vmem>>, vector<256x128xf32>
    %12 = arith.truncf %10 : vector<256x128xf32> to vector<256x128xbf16>
    %c0_9 = arith.constant 0 : index
    %c0_10 = arith.constant 0 : index
    %13 = vector.load %arg5[%c0_9, %c0_10] : memref<128x128xbf16, #tpu.memory_space<vmem>>, vector<128x128xbf16>
    %cst_11 = arith.constant dense<0.000000e+00> : vector<256x128xf32>
    %14 = tpu.matmul %12, %13, %cst_11 {dimension_numbers = #tpu.dot_dimension_numbers<[1], [0], [0], [1], [0, 0, 1, 1], [], []>} : vector<256x128xbf16>, vector<128x128xbf16>, vector<256x128xf32> -> vector<256x128xf32>
    %15 = arith.addf %11, %14 : vector<256x128xf32>
    %c0_12 = arith.constant 0 : index
    %c0_13 = arith.constant 0 : index
    %16 = vector.load %arg8[%c0_12, %c0_13] : memref<256x128xf32, #tpu.memory_space<vmem>>, vector<256x128xf32>
    tpu.vector_store %arg8[%c0_12, %c0_13], %15 {strides = array<i32>} : memref<256x128xf32, #tpu.memory_space<vmem>>, vector<256x128xf32>,
    %c0_i32_14 = arith.constant 0 : i32
    %17 = arith.cmpi eq, %arg1, %c0_i32_14 : i32
    %18 = arith.extui %17 : i1 to i32
    %c0_i32_15 = arith.constant 0 : i32
    %19 = arith.cmpi ne, %18, %c0_i32_15 : i32
    scf.if %19 {
      %c0_16 = arith.constant 0 : index
      %c0_17 = arith.constant 0 : index
      %20 = vector.load %arg8[%c0_16, %c0_17] : memref<256x128xf32, #tpu.memory_space<vmem>>, vector<256x128xf32>
      %c0_18 = arith.constant 0 : index
      %c0_19 = arith.constant 0 : index
      %21 = vector.load %arg6[%c0_18, %c0_19] : memref<1x128xf32, #tpu.memory_space<vmem>>, vector<1x128xf32>
      %22 = vector.broadcast %21 : vector<1x128xf32> to vector<256x128xf32>
      %23 = arith.addf %20, %22 : vector<256x128xf32>
      %c0_20 = arith.constant 0 : index
      %c0_21 = arith.constant 0 : index
      %24 = vector.load %arg7[%c0_20, %c0_21] : memref<256x128xf32, #tpu.memory_space<vmem>>, vector<256x128xf32>
      tpu.vector_store %arg7[%c0_20, %c0_21], %23 {strides = array<i32>} : memref<256x128xf32, #tpu.memory_space<vmem>>, vector<256x128xf32>,
    } else {
    }
    return
  }
  func.func @transform_0(%arg0: i32, %arg1: i32) -> (i32, i32) {
    %c0_i32 = arith.constant 0 : i32
    %c0_i32_0 = arith.constant 0 : i32
    return %arg0, %c0_i32 : i32, i32
  }
  func.func @transform_1(%arg0: i32, %arg1: i32) -> (i32, i32) {
    %c0_i32 = arith.constant 0 : i32
    %c0_i32_0 = arith.constant 0 : i32
    return %c0_i32, %arg1 : i32, i32
  }
  func.func @transform_2(%arg0: i32, %arg1: i32) -> (i32, i32) {
    %c0_i32 = arith.constant 0 : i32
    %c0_i32_0 = arith.constant 0 : i32
    return %c0_i32, %arg1 : i32, i32
  }
  func.func @transform_3(%arg0: i32, %arg1: i32) -> (i32, i32) {
    %c0_i32 = arith.constant 0 : i32
    %c0_i32_0 = arith.constant 0 : i32
    return %arg1, %c0_i32 : i32, i32
  }
  func.func @transform_4(%arg0: i32, %arg1: i32) -> (i32, i32) {
    %c0_i32 = arith.constant 0 : i32
    %c0_i32_0 = arith.constant 0 : i32
    %c0_i32_1 = arith.constant 0 : i32
    return %c0_i32, %c0_i32_0 : i32, i32
  }
  func.func @transform_5(%arg0: i32, %arg1: i32) -> (i32, i32) {
    %c0_i32 = arith.constant 0 : i32
    %c0_i32_0 = arith.constant 0 : i32
    return %arg0, %c0_i32 : i32, i32
  }
}

</mosaic_0001>

<bundles_post_ra>
// kernel: tpu_custom_call.1
= control target key start
LH: loop header
LB: loop body
LE: loop exit
PB: predicated region body
PF: predicated region fallthrough
CT: control target
= control target key end

     0   :  { %s2166_s0 = inlined_call_operand.hbm [shape: bf16[512,128], index: 0, kind: input, shape index: {}]   ;;  %s2167_s1 = inlined_call_operand.hbm [shape: bf16[128,128], index: 1, kind: input, shape index: {}]   ;;  %s2168_s2 = inlined_call_operand.vmem [shape: f32[1,128], index: 2, kind: input, shape index: {}]   ;;  %s2169_s3 = inlined_call_operand.hbm [shape: bf16[128,128], index: 3, kind: input, shape index: {}]   ;;  %s2170_s4 = inlined_call_operand.vmem [shape: f32[1,128], index: 4, kind: input, shape index: {}]   ;;  %s2171_s5 = inlined_call_operand.hbm [shape: f32[512,128], index: 5, kind: output, shape index: {}]  }
   0x1   :  { %2174 = sst [smem:[#allocation13_spill]] %s2167_s1 }
   0x2   :  { %10 = vsyncpa [#allocation4], 0 }
   0x3   :  { %12 = vsyncpa [#allocation4 + $0x1], 0 }
   0x4   :  { %13 = vsyncpa [#allocation7], 0 }
   0x5   :  { %14 = vsyncpa [#allocation5], 0 }
   0x6   :  { %16 = vsyncpa [#allocation5 + $0x1], 0  ;;  %s1841_s18 = smov 0   ;;  %s1843_s19 = smov 0  }
   0x7   :  { %s1845_s20 = smov 0   ;;  %s1847_s21 = smov 0  }
   0x8   :  { %s1849_s22 = smov 0   ;;  %s1851_s23 = smov 0  }
   0x9 LB: > { %s1318_s24 = sadd.s32 4294967295, %s1801_s23   ;;  %s1319_s25 = sadd.s32 4294967294, %s1801_s23   ;;  %s1801_s23 = sphi %s1851_s23, %s22_s23   ;;  %s1797_s22 = sphi %s1849_s22, %s2192_s22   ;;  %s1793_s21 = sphi %s1847_s21, %s2191_s21   ;;  %s1789_s20 = sphi %s1845_s20, %s2190_s20   ;;  %s1785_s19 = sphi %s1843_s19, %s2189_s19   ;;  %s1781_s18 = sphi %s1841_s18, %s2188_s18  }
   0xa   : > { %p54_p0 = scmp.ne.s32.totalorder %s1785_s19, %s1781_s18  ;;  %p1875_p1 = scmp.eq.s32.totalorder %s1318_s24, 0 }
   0xb   : > { %p1879_p2 = scmp.eq.s32.totalorder %s1318_s24, 1  ;;  %p183_p3 = scmp.eq.s32.totalorder %s1319_s25, 1 }
   0xc   : > { %p1885_p4 = por %p1875_p1, %p54_p0  ;;  %p1320_p5 = scmp.ge.s32.totalorder %s1801_s23, 1 }
   0xd   : > { %p1890_p6 = por %p183_p3, %p54_p0  ;;  %p190_p7 = scmp.lt.s32.totalorder %s1801_s23, 3 }
   0xe   : > { %s1803_s6 = smov [#allocation6]   ;;  %s1804_s9 = smov [#allocation8]  }
   0xf   : > { %s2178_s29 = scalar_select %p1890_p6, 1, 0 }
  0x10   : > { %p1895_p8 = pnand %p1320_p5, %p190_p7  ;;  %s204_s7 = sshll.u32 %s1803_s6, 4  ;;  %s205_s7 = int_to_ptr.vmem [resolvable:$true] %s204_s7 }
  0x11   : > { %s226_s10 = sshll.u32 %s1804_s9, 4  ;;  %s1648_s11 = scalar_lea.vmem %s205_s7, 1024  ;;  %s227_s10 = int_to_ptr.vmem [resolvable:$true] %s226_s10 }
  0x12   : > { %p1530_p9 = pneg %p1895_p8  ;;  %p1649_p13 = scmp.ne.s32.totalorder %s205_s7, %s1648_s11 }
  0x13   : > { %p1656_p5 = scmp.lt.s32.totalorder %s205_s7, %s205_s7  ;;  %p1657_p7 = scmp.lt.s32.totalorder %s1648_s11, %s1648_s11 }
  0x14   : > { %p1904_p11 = pnand %p1530_p9, %p1875_p1 }
  0x15   : > { %p1658_p10 = por %p1657_p7, %p1656_p5 }
  0x16   : > { %p1639_p12 = pneg %p1904_p11 }
  0x18   : > { %p1651_p0 = pnand %p1649_p13, %p1639_p12 }
  0x1a   : > { %p1652_p3 = pneg %p1651_p0 }
  0x1c   : > { %p1659_p9 = pnand %p1658_p10, %p1652_p3 }
  0x1e   : > { %1662 = shalt.err (!%p1659_p9)
}
  0x1f   : > { %s2172_s12 = smov 64   ;;  %s2173_s13 = smov 4  }
  0x20   : > { %s2181_s1 = sld [smem:[#allocation13_spill]]  ;;  %s1674_s16 = scalar_lea.vmem %s227_s10, 1024 }
  0x21   : > { %p1675_p13 = scmp.ne.s32.totalorder %s227_s10, %s1674_s16  ;;  %p1682_p10 = scmp.lt.s32.totalorder %s227_s10, %s227_s10 }
  0x22   : > { %p1683_p3 = scmp.lt.s32.totalorder %s1674_s16, %s1674_s16 }
  0x23   : > { %p1677_p0 = pnand %p1675_p13, %p1639_p12 }
  0x24   : > { %p1684_p7 = por %p1683_p3, %p1682_p10 }
  0x25   : > { %p1678_p5 = pneg %p1677_p0 }
  0x26   : > { %1533 = dma.hbm_to_vmem [thread:$0]  (!%p1904_p11), %s2181_s1, 1024, %s205_s7, [#allocation7], %s2172_s12, %s2172_s12, %s2173_s13  }
  0x27   : > { %p1685_p9 = pnand %p1684_p7, %p1678_p5 }
  0x29   : > { %1688 = shalt.err (!%p1685_p9)
}
  0x2a   : > { %1536 = dma.hbm_to_vmem [thread:$0]  (!%p1904_p11), %s2169_s3, 1024, %s227_s10, [#allocation7], %s2172_s12, %s2172_s12, %s2173_s13  }
  0x2b   : > { %s34_s25 = sadd.s32 1, %s1797_s22  ;;  %s41_s6 = sadd.s32 1, %s1789_s20 }
  0x2c   : > { %p36_p12 = scmp.ge.s32.totalorder %s34_s25, 2  ;;  %p48_p13 = scmp.ne.s32.totalorder %s1789_s20, %s1785_s19 }
  0x2d   : > { %p49_p0 = scmp.eq.s32.totalorder %s1801_s23, 0  ;;  %p1547_p5 = scmp.lt.s32.totalorder %s1801_s23, 2 }
  0x2e   : > { %s2194_s25 = smov (%p36_p12, %s34_s25), 0  ;;  %p1942_p3 = por %p1879_p2, %p48_p13 }
  0x2f   : > { %p50_p10 = por %p49_p0, %p48_p13  ;;  %s38_s8 = ssub.s32 %s1797_s22, %s2194_s25 }
  0x30   : > { %s243_s9 = sand.u32 1, %s1789_s20   ;;  %p39_p7 = scmp.eq.s32.totalorder %s38_s8, 0 }
  0x31   : > { %s1325_s10 = sshll.u32 %s243_s9, 7  ;;  %s1372_s11 = sshll.u32 %s1797_s22, 11 }
  0x32   : > { %s1951_s14 = scalar_select %p39_p7, %s1789_s20, %s41_s6  }
  0x33   : > { %s253_s17 = scalar_lea.hbm %s2166_s0, %s1372_s11  ;;  %s247_s24 = scalar_lea.vmem [#allocation3], %s1325_s10 }
  0x34   : > { %s254_s12 = sshll.u32 %s247_s24, 4  ;;  %p1958_p11 = pnand %p1547_p5, %p50_p10  ;;  %s255_s12 = int_to_ptr.vmem [resolvable:$true] %s254_s12 }
  0x35   : > { %s244_s13 = scalar_lea.sflag [#allocation4], %s243_s9  ;;  %s1702_s8 = scalar_lea.vmem %s255_s12, 2048 }
  0x36   : > { %p1691_p2 = pneg %p1958_p11  ;;  %p1703_p9 = scmp.ne.s32.totalorder %s255_s12, %s1702_s8 }
  0x37   : > { %s1807_s6 = smov [#allocation3]  }
  0x38   : > { %p1705_p12 = pnand %p1703_p9, %p1691_p2  ;;  %s1707_s1 = sshll.u32 %s1807_s6, 4  ;;  %s1708_s1 = int_to_ptr.vmem [resolvable:$false] %s1707_s1 }
  0x39   : > { %s1709_s11 = scalar_lea.vmem %s1708_s1, 4096  ;;  %p1710_p0 = scmp.lt.s32.totalorder %s255_s12, %s1708_s1 }
  0x3a   : > { %p1706_p13 = pneg %p1705_p12  ;;  %p1711_p7 = scmp.lt.s32.totalorder %s1709_s11, %s1702_s8 }
  0x3c   : > { %p1712_p6 = por %p1711_p7, %p1710_p0 }
  0x3e   : > { %p1713_p5 = pnand %p1712_p6, %p1706_p13 }
  0x40   : > { %1716 = shalt.err (!%p1713_p5)
}
  0x41   : > { %s2184_s10 = smov 4   ;;  %s2185_s15 = smov 64  }
  0x42   : > { %1540 = dma.hbm_to_vmem [thread:$0]  (!%p1958_p11), %s253_s17, 2048, %s255_s12, %s244_s13, %s2185_s15, %s2185_s15, %s2184_s10  }
  0x43   : > { %266 = sbr.rel (%p1895_p8) target bundleno = 585 (0x249), region = 40  ;;  %s1972_s9 = sand.u32 (!%p1895_p8), 1, %s1785_s19  }
  0x44   : > { %s1329_s1 = sshll.u32 (!%p1895_p8), %s1972_s9, 7  ;;  %s269_s16 = scalar_lea.sflag (!%p1895_p8), [#allocation4], %s1972_s9 }
  0x45   : > { %s1976_s24 = scalar_lea.vmem (!%p1895_p8), [#allocation3], %s1329_s1 }
  0x48   : > { %1768 = dma.done.wait (%p1885_p4), %s269_s16, 2048  }
  0x49   : > { %1770 = vsyncadd (%p1885_p4), %s269_s16, 4294965248 }
  0x4a   : > { %1772 = dma.done.wait (%p1875_p1), [#allocation7], 2048  }
  0x4b   : > { %1774 = vsyncadd (%p1875_p1), [#allocation7], 4294965248  ;;  %v1605_v0 = vld [vmem:[#allocation6 + $0x38] sm:$0xff]   ;;  %v1606_v1 = vld [vmem:[#allocation6 + $0x30] sm:$0xff]   ;;  %s1332_s30 = sshll.u32 %s1972_s9, 8  ;;  %s1373_s27 = sshll.u32 %s1793_s21, 12 }
  0x4c   : > { %1422 = vmatprep.subr.bf16.mxu0 %v1605_v0  ;;  %v1607_v2 = vld [vmem:[#allocation6 + $0x28] sm:$0xff]   ;;  %v1608_v3 = vld [vmem:[#allocation6 + $0x20] sm:$0xff]   ;;  %v1609_v5 = vld [vmem:[#allocation6 + $0x18] sm:$0xff]   ;;  %s2046_s17 = scalar_lea.vmem [#allocation9], %s1332_s30  ;;  %s2113_s10 = scalar_lea.hbm %s2171_s5, %s1373_s27 }
  0x4d   : > { %1423 = vmatpush3.bf16.msra.mxu0 %v1605_v0  ;;  %v1613_v4 = vld [vmem:[%s1976_s24] sm:$0xff]   ;;  %v1610_v6 = vld [vmem:[#allocation6 + $0x10] sm:$0xff]   ;;  %v1611_v7 = vld [vmem:[#allocation6 + $0x8] sm:$0xff]   ;;  %s1202_s8 = sshll.u32 %s2046_s17, 4  ;;  %s1189_s21 = scalar_lea.sflag [#allocation5], %s1972_s9  ;;  %s2115_s8 = int_to_ptr.vmem [resolvable:$true] %s1202_s8 }
  0x4e   : > { %1424 = vmatprep.subr.bf16.mxu0 %v1606_v1  ;;  %1438 = vmatprep.mubr.bf16.mxu0 %v1613_v4  ;;  %v1612_v8 = vld [vmem:[#allocation6] sm:$0xff]   ;;  %v1629_v9 = vld [vmem:[#allocation8 + $0x38] sm:$0xff]   ;;  %v1630_v10 = vld [vmem:[#allocation8 + $0x30] sm:$0xff]   ;;  %s1717_s15 = scalar_lea.vmem %s2115_s8, 4096  ;;  %s1808_s1 = smov [#allocation9]  }
  0x4f   : > { %1470 = vmatprep.subr.bf16.mxu1 %v1629_v9  ;;  %v1614_v11 = vld [vmem:[%s1976_s24 + $0x8] sm:$0xff]   ;;  %v1615_v13 = vld [vmem:[%s1976_s24 + $0x10] sm:$0xff]   ;;  %v1632_v14 = vld [vmem:[#allocation8 + $0x20] sm:$0xff]   ;;  %p1718_p1 = scmp.ne.s32.totalorder %s2115_s8, %s1717_s15  ;;  %s1721_s16 = sshll.u32 %s1808_s1, 4  ;;  %s1722_s16 = int_to_ptr.vmem [resolvable:$false] %s1721_s16 }
  0x50   : > { %1471 = vmatpush3.bf16.msra.mxu1 %v1629_v9  ;;  %v1631_v12 = vld [vmem:[#allocation8 + $0x28] sm:$0xff]   ;;  %v1633_v15 = vld [vmem:[#allocation8 + $0x18] sm:$0xff]   ;;  %v1617_v17 = vld [vmem:[%s1976_s24 + $0x20] sm:$0xff]   ;;  %p1724_p8 = scmp.lt.s32.totalorder %s2115_s8, %s1722_s16 }
  0x51   : > { %1425 = vmatpush3.bf16.msra.mxu0 %v1606_v1  ;;  %1472 = vmatprep.subr.bf16.mxu1 %v1630_v10  ;;  %v1616_v16 = vld [vmem:[%s1976_s24 + $0x18] sm:$0xff]   ;;  %v1618_v18 = vld [vmem:[%s1976_s24 + $0x28] sm:$0xff]   ;;  %v1619_v19 = vld [vmem:[%s1976_s24 + $0x30] sm:$0xff]   ;;  %p1719_p4 = pnand %p1718_p1, %p1942_p3 }
  0x52   : > { %1426 = vmatprep.subr.bf16.mxu0 %v1607_v2  ;;  %v1620_v20 = vld [vmem:[%s1976_s24 + $0x38] sm:$0xff]   ;;  %v1621_v21 = vld [vmem:[%s1976_s24 + $0x40] sm:$0xff]   ;;  %v1622_v22 = vld [vmem:[%s1976_s24 + $0x48] sm:$0xff]  }
  0x53   : > { %v1623_v23 = vld [vmem:[%s1976_s24 + $0x50] sm:$0xff]   ;;  %v1624_v24 = vld [vmem:[%s1976_s24 + $0x58] sm:$0xff]   ;;  %v1625_v25 = vld [vmem:[%s1976_s24 + $0x60] sm:$0xff]   ;;  %p1720_p6 = pneg %p1719_p4 }
  0x54   : > { %1473 = vmatpush3.bf16.msra.mxu1 %v1630_v10  ;;  %v1626_v26 = vld [vmem:[%s1976_s24 + $0x68] sm:$0xff]   ;;  %v1627_v27 = vld [vmem:[%s1976_s24 + $0x70] sm:$0xff]   ;;  %v1628_v28 = vld [vmem:[%s1976_s24 + $0x78] sm:$0xff]   ;;  %s1723_s24 = scalar_lea.vmem %s1722_s16, 8192 }
  0x55   : > { %1427 = vmatpush3.bf16.msra.mxu0 %v1607_v2  ;;  %1474 = vmatprep.subr.bf16.mxu1 %v1631_v12  ;;  %v1634_v29 = vld [vmem:[#allocation8 + $0x10] sm:$0xff]   ;;  %v1635_v30 = vld [vmem:[#allocation8 + $0x8] sm:$0xff]   ;;  %v1636_v31 = vld [vmem:[#allocation8] sm:$0xff]   ;;  %p1725_p10 = scmp.lt.s32.totalorder %s1723_s24, %s1717_s15 }
  0x56   : > { %1428 = vmatprep.subr.bf16.mxu0 %v1608_v3  ;;  %v2005_v34 = vld [vmem:[%s2168_s2] ss:$0 sm:$0xff] }
  0x57   : > { %p1726_p11 = por %p1725_p10, %p1724_p8 }
  0x58   : > { %1475 = vmatpush3.bf16.msra.mxu1 %v1631_v12 }
  0x59   : > { %1429 = vmatpush3.bf16.msra.mxu0 %v1608_v3  ;;  %1476 = vmatprep.subr.bf16.mxu1 %v1632_v14  ;;  %p1727_p2 = pnand %p1726_p11, %p1720_p6 }
  0x5a   : > { %1430 = vmatprep.subr.bf16.mxu0 %v1609_v5 }
  0x5c   : > { %1477 = vmatpush3.bf16.msra.mxu1 %v1632_v14 }
  0x5d   : > { %1431 = vmatpush3.bf16.msra.mxu0 %v1609_v5  ;;  %1478 = vmatprep.subr.bf16.mxu1 %v1633_v15 }
  0x5e   : > { %1432 = vmatprep.subr.bf16.mxu0 %v1610_v6 }
  0x60   : > { %1479 = vmatpush3.bf16.msra.mxu1 %v1633_v15 }
  0x61   : > { %1433 = vmatpush3.bf16.msra.mxu0 %v1610_v6  ;;  %1480 = vmatprep.subr.bf16.mxu1 %v1634_v29 }
  0x62   : > { %1434 = vmatprep.subr.bf16.mxu0 %v1611_v7 }
  0x64   : > { %1481 = vmatpush3.bf16.msra.mxu1 %v1634_v29 }
  0x65   : > { %1435 = vmatpush3.bf16.msra.mxu0 %v1611_v7  ;;  %1482 = vmatprep.subr.bf16.mxu1 %v1635_v30 }
  0x66   : > { %1436 = vmatprep.subr.bf16.mxu0 %v1612_v8 }
  0x68   : > { %1483 = vmatpush3.bf16.msra.mxu1 %v1635_v30 }
  0x69   : > { %1437 = vmatpush3.bf16.msra.mxu0 %v1612_v8  ;;  %1484 = vmatprep.subr.bf16.mxu1 %v1636_v31 }
  0x6c   : > { %1439 = vmatmul.mubr.bf16.vlgmr.msra.gmra.mxu0 %v1614_v11  ;;  %1485 = vmatpush3.bf16.msra.mxu1 %v1636_v31 }
  0x6d   : > { %1442 = vmatprep.mubr.bf16.mxu0 %v1615_v13 }
  0x74   : > { %1443 = vmatmul.mubr.bf16.gmra.mxu0 %v1616_v16 }
  0x75   : > { %1446 = vmatprep.mubr.bf16.mxu0 %v1617_v17 }
  0x7c   : > { %1447 = vmatmul.mubr.bf16.gmra.mxu0 %v1618_v18 }
  0x7d   : > { %1450 = vmatprep.mubr.bf16.mxu0 %v1619_v19 }
  0x84   : > { %1451 = vmatmul.mubr.bf16.gmra.mxu0 %v1620_v20 }
  0x85   : > { %1454 = vmatprep.mubr.bf16.mxu0 %v1621_v21 }
  0x8c   : > { %1455 = vmatmul.mubr.bf16.gmra.mxu0 %v1622_v22 }
  0x8d   : > { %1458 = vmatprep.mubr.bf16.mxu0 %v1623_v23 }
  0x94   : > { %1459 = vmatmul.mubr.bf16.gmra.mxu0 %v1624_v24 }
  0x95   : > { %1462 = vmatprep.mubr.bf16.mxu0 %v1625_v25 }
  0x9c   : > { %1463 = vmatmul.mubr.bf16.gmra.mxu0 %v1626_v26 }
  0x9d   : > { %1466 = vmatprep.mubr.bf16.mxu0 %v1627_v27 }
  0xa4   : > { %1467 = vmatmul.mubr.bf16.gmra.mxu0 %v1628_v28 }
 0x12c   : > { %v1440_v32 = vpop.f32.mrf.mxu0 }
 0x12d   : > { %v595_v38 = vadd.f32 %v1440_v32, %v2005_v34 }
 0x12e   : > { %v586_v33 = vpop.f32.mrf.mxu0 }
 0x12f   : > { %v587_v36 = vadd.f32 %v2005_v34, %v586_v33  ;;  %v715_v45 = vmax.f32 %v595_v38, 0.0 }
 0x130   : > { %v1441_v35 = vpop.f32.mrf.mxu0 }
 0x131   : > { %v598_v37 = vadd.f32 %v1441_v35, %v2005_v34  ;;  %v713_v43 = vmax.f32 %v587_v36, 0.0 }
 0x132   : > { %v589_v39 = vpop.f32.mrf.mxu0 }
 0x133   : > { %v590_v40 = vadd.f32 %v2005_v34, %v589_v39  ;;  %v716_v41 = vmax.f32 %v598_v37, 0.0 }
 0x134   : > { %v1444_v42 = vpop.f32.mrf.mxu0 }
 0x135   : > { %v714_v44 = vmax.f32 %v590_v40, 0.0  ;;  %v778_v48 = vpack.c.bf16 %v716_v41, %v715_v45  ;;  %v611_v52 = vadd.f32 %v1444_v42, %v2005_v34 }
 0x136   : > { %v602_v46 = vpop.f32.mrf.mxu0 }
 0x137   : > { %v777_v47 = vpack.c.bf16 %v714_v44, %v713_v43  ;;  %v603_v50 = vadd.f32 %v2005_v34, %v602_v46  ;;  %v719_v59 = vmax.f32 %v611_v52, 0.0 }
 0x138   : > { %v1445_v49 = vpop.f32.mrf.mxu0 }
 0x139   : > { %v614_v51 = vadd.f32 %v1445_v49, %v2005_v34  ;;  %1486 = vmatprep.mubr.bf16.mxu1 %v777_v47  ;;  %v717_v57 = vmax.f32 %v603_v50, 0.0 }
 0x13a   : > { %v605_v53 = vpop.f32.mrf.mxu0  ;;  %1487 = vmatmul.mubr.bf16.vlgmr.msra.gmra.mxu1 %v778_v48 }
 0x13b   : > { %v606_v54 = vadd.f32 %v2005_v34, %v605_v53  ;;  %v720_v55 = vmax.f32 %v614_v51, 0.0 }
 0x13c   : > { %v1448_v56 = vpop.f32.mrf.mxu0 }
 0x13d   : > { %v718_v58 = vmax.f32 %v606_v54, 0.0  ;;  %v780_v62 = vpack.c.bf16 %v720_v55, %v719_v59  ;;  %v627_v2 = vadd.f32 %v1448_v56, %v2005_v34 }
 0x13e   : > { %v618_v60 = vpop.f32.mrf.mxu0 }
 0x13f   : > { %v779_v61 = vpack.c.bf16 %v718_v58, %v717_v57  ;;  %v619_v0 = vadd.f32 %v2005_v34, %v618_v60  ;;  %v723_v9 = vmax.f32 %v627_v2, 0.0 }
 0x140   : > { %v1449_v63 = vpop.f32.mrf.mxu0 }
 0x141   : > { %v630_v1 = vadd.f32 %v1449_v63, %v2005_v34  ;;  %1490 = vmatprep.mubr.bf16.mxu1 %v779_v61  ;;  %v721_v7 = vmax.f32 %v619_v0, 0.0 }
 0x142   : > { %v621_v3 = vpop.f32.mrf.mxu0  ;;  %1491 = vmatmul.mubr.bf16.gmra.mxu1 %v780_v62 }
 0x143   : > { %v622_v4 = vadd.f32 %v2005_v34, %v621_v3  ;;  %v724_v5 = vmax.f32 %v630_v1, 0.0 }
 0x144   : > { %v1452_v6 = vpop.f32.mrf.mxu0 }
 0x145   : > { %v722_v8 = vmax.f32 %v622_v4, 0.0  ;;  %v782_v12 = vpack.c.bf16 %v724_v5, %v723_v9  ;;  %v643_v16 = vadd.f32 %v1452_v6, %v2005_v34 }
 0x146   : > { %v634_v10 = vpop.f32.mrf.mxu0 }
 0x147   : > { %v781_v11 = vpack.c.bf16 %v722_v8, %v721_v7  ;;  %v635_v14 = vadd.f32 %v2005_v34, %v634_v10  ;;  %v727_v23 = vmax.f32 %v643_v16, 0.0 }
 0x148   : > { %v1453_v13 = vpop.f32.mrf.mxu0 }
 0x149   : > { %v646_v15 = vadd.f32 %v1453_v13, %v2005_v34  ;;  %1494 = vmatprep.mubr.bf16.mxu1 %v781_v11  ;;  %v725_v21 = vmax.f32 %v635_v14, 0.0 }
 0x14a   : > { %v637_v17 = vpop.f32.mrf.mxu0  ;;  %1495 = vmatmul.mubr.bf16.gmra.mxu1 %v782_v12 }
 0x14b   : > { %v638_v18 = vadd.f32 %v2005_v34, %v637_v17  ;;  %v728_v19 = vmax.f32 %v646_v15, 0.0 }
 0x14c   : > { %v1456_v20 = vpop.f32.mrf.mxu0 }
 0x14d   : > { %v726_v22 = vmax.f32 %v638_v18, 0.0  ;;  %v784_v26 = vpack.c.bf16 %v728_v19, %v727_v23  ;;  %v659_v30 = vadd.f32 %v1456_v20, %v2005_v34  ;;  %v2043_v18 = vld [vmem:[%s2170_s4] ss:$0 sm:$0xff] }
 0x14e   : > { %v650_v24 = vpop.f32.mrf.mxu0 }
 0x14f   : > { %v783_v25 = vpack.c.bf16 %v726_v22, %v725_v21  ;;  %v651_v28 = vadd.f32 %v2005_v34, %v650_v24  ;;  %v731_v38 = vmax.f32 %v659_v30, 0.0 }
 0x150   : > { %v1457_v27 = vpop.f32.mrf.mxu0 }
 0x151   : > { %v662_v29 = vadd.f32 %v1457_v27, %v2005_v34  ;;  %1498 = vmatprep.mubr.bf16.mxu1 %v783_v25  ;;  %v729_v36 = vmax.f32 %v651_v28, 0.0 }
 0x152   : > { %v653_v31 = vpop.f32.mrf.mxu0  ;;  %1499 = vmatmul.mubr.bf16.gmra.mxu1 %v784_v26 }
 0x153   : > { %v654_v32 = vadd.f32 %v2005_v34, %v653_v31  ;;  %v732_v33 = vmax.f32 %v662_v29, 0.0 }
 0x154   : > { %v1460_v35 = vpop.f32.mrf.mxu0 }
 0x155   : > { %v730_v37 = vmax.f32 %v654_v32, 0.0  ;;  %v786_v41 = vpack.c.bf16 %v732_v33, %v731_v38  ;;  %v675_v45 = vadd.f32 %v1460_v35, %v2005_v34 }
 0x156   : > { %v666_v39 = vpop.f32.mrf.mxu0 }
 0x157   : > { %v785_v40 = vpack.c.bf16 %v730_v37, %v729_v36  ;;  %v667_v43 = vadd.f32 %v2005_v34, %v666_v39  ;;  %v735_v52 = vmax.f32 %v675_v45, 0.0 }
 0x158   : > { %v1461_v42 = vpop.f32.mrf.mxu0 }
 0x159   : > { %v678_v44 = vadd.f32 %v1461_v42, %v2005_v34  ;;  %1502 = vmatprep.mubr.bf16.mxu1 %v785_v40  ;;  %v733_v50 = vmax.f32 %v667_v43, 0.0 }
 0x15a   : > { %v669_v46 = vpop.f32.mrf.mxu0  ;;  %1503 = vmatmul.mubr.bf16.gmra.mxu1 %v786_v41 }
 0x15b   : > { %v670_v47 = vadd.f32 %v2005_v34, %v669_v46  ;;  %v736_v48 = vmax.f32 %v678_v44, 0.0 }
 0x15c   : > { %v1464_v49 = vpop.f32.mrf.mxu0 }
 0x15d   : > { %v734_v51 = vmax.f32 %v670_v47, 0.0  ;;  %v788_v55 = vpack.c.bf16 %v736_v48, %v735_v52  ;;  %v691_v59 = vadd.f32 %v1464_v49, %v2005_v34 }
 0x15e   : > { %v682_v53 = vpop.f32.mrf.mxu0 }
 0x15f   : > { %v787_v54 = vpack.c.bf16 %v734_v51, %v733_v50  ;;  %v683_v57 = vadd.f32 %v2005_v34, %v682_v53  ;;  %v739_v2 = vmax.f32 %v691_v59, 0.0 }
 0x160   : > { %v1465_v56 = vpop.f32.mrf.mxu0 }
 0x161   : > { %v694_v58 = vadd.f32 %v1465_v56, %v2005_v34  ;;  %1506 = vmatprep.mubr.bf16.mxu1 %v787_v54  ;;  %v737_v0 = vmax.f32 %v683_v57, 0.0 }
 0x162   : > { %v685_v60 = vpop.f32.mrf.mxu0  ;;  %1507 = vmatmul.mubr.bf16.gmra.mxu1 %v788_v55 }
 0x163   : > { %v686_v61 = vadd.f32 %v2005_v34, %v685_v60  ;;  %v740_v62 = vmax.f32 %v694_v58, 0.0 }
 0x164   : > { %v1468_v63 = vpop.f32.mrf.mxu0 }
 0x165   : > { %v738_v1 = vmax.f32 %v686_v61, 0.0  ;;  %v790_v5 = vpack.c.bf16 %v740_v62, %v739_v2  ;;  %v707_v9 = vadd.f32 %v1468_v63, %v2005_v34 }
 0x166   : > { %v698_v3 = vpop.f32.mrf.mxu0 }
 0x167   : > { %v789_v4 = vpack.c.bf16 %v738_v1, %v737_v0  ;;  %v699_v7 = vadd.f32 %v2005_v34, %v698_v3  ;;  %v743_v15 = vmax.f32 %v707_v9, 0.0 }
 0x168   : > { %v1469_v6 = vpop.f32.mrf.mxu0 }
 0x169   : > { %v710_v8 = vadd.f32 %v1469_v6, %v2005_v34  ;;  %1510 = vmatprep.mubr.bf16.mxu1 %v789_v4  ;;  %v741_v13 = vmax.f32 %v699_v7, 0.0 }
 0x16a   : > { %v701_v10 = vpop.f32.mrf.mxu0  ;;  %1511 = vmatmul.mubr.bf16.gmra.mxu1 %v790_v5 }
 0x16b   : > { %v702_v11 = vadd.f32 %v2005_v34, %v701_v10  ;;  %v744_v12 = vmax.f32 %v710_v8, 0.0 }
 0x16d   : > { %v742_v14 = vmax.f32 %v702_v11, 0.0  ;;  %v792_v17 = vpack.c.bf16 %v744_v12, %v743_v15 }
 0x16f   : > { %v791_v16 = vpack.c.bf16 %v742_v14, %v741_v13 }
 0x171   : > { %1514 = vmatprep.mubr.bf16.mxu1 %v791_v16 }
 0x172   : > { %1515 = vmatmul.mubr.bf16.gmra.mxu1 %v792_v17 }
 0x1fa   : > { %v1488_v19 = vpop.f32.mrf.mxu1 }
 0x1fb   : > { %v1126_v20 = vadd.f32 %v1488_v19, %v2043_v18 }
 0x1fc   : > { %v891_v21 = vpop.f32.mrf.mxu1 }
 0x1fd   : > { %1158 = vst [vmem:[%s2046_s17 + $0x10] sm:$0xff] %v1126_v20  ;;  %v1124_v34 = vadd.f32 %v2043_v18, %v891_v21 }
 0x1fe   : > { %v1489_v22 = vpop.f32.mrf.mxu1 }
 0x1ff   : > { %1156 = vst [vmem:[%s2046_s17] sm:$0xff] %v1124_v34  ;;  %v1127_v23 = vadd.f32 %v1489_v22, %v2043_v18 }
 0x200   : > { %v894_v24 = vpop.f32.mrf.mxu1 }
 0x201   : > { %1159 = vst [vmem:[%s2046_s17 + $0x18] sm:$0xff] %v1127_v23  ;;  %v1125_v25 = vadd.f32 %v2043_v18, %v894_v24 }
 0x202   : > { %v1492_v26 = vpop.f32.mrf.mxu1 }
 0x203   : > { %1157 = vst [vmem:[%s2046_s17 + $0x8] sm:$0xff] %v1125_v25  ;;  %v1130_v27 = vadd.f32 %v1492_v26, %v2043_v18 }
 0x204   : > { %v907_v28 = vpop.f32.mrf.mxu1 }
 0x205   : > { %1162 = vst [vmem:[%s2046_s17 + $0x30] sm:$0xff] %v1130_v27  ;;  %v1128_v29 = vadd.f32 %v2043_v18, %v907_v28 }
 0x206   : > { %v1493_v30 = vpop.f32.mrf.mxu1 }
 0x207   : > { %1160 = vst [vmem:[%s2046_s17 + $0x20] sm:$0xff] %v1128_v29  ;;  %v1131_v31 = vadd.f32 %v1493_v30, %v2043_v18 }
 0x208   : > { %v910_v32 = vpop.f32.mrf.mxu1 }
 0x209   : > { %1163 = vst [vmem:[%s2046_s17 + $0x38] sm:$0xff] %v1131_v31  ;;  %v1129_v33 = vadd.f32 %v2043_v18, %v910_v32 }
 0x20a   : > { %v1496_v35 = vpop.f32.mrf.mxu1 }
 0x20b   : > { %1161 = vst [vmem:[%s2046_s17 + $0x28] sm:$0xff] %v1129_v33  ;;  %v1134_v36 = vadd.f32 %v1496_v35, %v2043_v18 }
 0x20c   : > { %v923_v37 = vpop.f32.mrf.mxu1 }
 0x20d   : > { %1166 = vst [vmem:[%s2046_s17 + $0x50] sm:$0xff] %v1134_v36  ;;  %v1132_v38 = vadd.f32 %v2043_v18, %v923_v37 }
 0x20e   : > { %v1497_v39 = vpop.f32.mrf.mxu1 }
 0x20f   : > { %1164 = vst [vmem:[%s2046_s17 + $0x40] sm:$0xff] %v1132_v38  ;;  %v1135_v40 = vadd.f32 %v1497_v39, %v2043_v18 }
 0x210   : > { %v926_v41 = vpop.f32.mrf.mxu1 }
 0x211   : > { %1167 = vst [vmem:[%s2046_s17 + $0x58] sm:$0xff] %v1135_v40  ;;  %v1133_v42 = vadd.f32 %v2043_v18, %v926_v41 }
 0x212   : > { %v1500_v43 = vpop.f32.mrf.mxu1 }
 0x213   : > { %1165 = vst [vmem:[%s2046_s17 + $0x48] sm:$0xff] %v1133_v42  ;;  %v1138_v44 = vadd.f32 %v1500_v43, %v2043_v18 }
 0x214   : > { %v939_v45 = vpop.f32.mrf.mxu1 }
 0x215   : > { %1170 = vst [vmem:[%s2046_s17 + $0x70] sm:$0xff] %v1138_v44  ;;  %v1136_v46 = vadd.f32 %v2043_v18, %v939_v45 }
 0x216   : > { %v1501_v47 = vpop.f32.mrf.mxu1 }
 0x217   : > { %1168 = vst [vmem:[%s2046_s17 + $0x60] sm:$0xff] %v1136_v46  ;;  %v1139_v48 = vadd.f32 %v1501_v47, %v2043_v18 }
 0x218   : > { %v942_v49 = vpop.f32.mrf.mxu1 }
 0x219   : > { %1171 = vst [vmem:[%s2046_s17 + $0x78] sm:$0xff] %v1139_v48  ;;  %v1137_v50 = vadd.f32 %v2043_v18, %v942_v49 }
 0x21a   : > { %v1504_v51 = vpop.f32.mrf.mxu1 }
 0x21b   : > { %1169 = vst [vmem:[%s2046_s17 + $0x68] sm:$0xff] %v1137_v50  ;;  %v1142_v52 = vadd.f32 %v1504_v51, %v2043_v18 }
 0x21c   : > { %v955_v53 = vpop.f32.mrf.mxu1 }
 0x21d   : > { %1174 = vst [vmem:[%s2046_s17 + $0x90] sm:$0xff] %v1142_v52  ;;  %v1140_v54 = vadd.f32 %v2043_v18, %v955_v53 }
 0x21e   : > { %v1505_v55 = vpop.f32.mrf.mxu1 }
 0x21f   : > { %1172 = vst [vmem:[%s2046_s17 + $0x80] sm:$0xff] %v1140_v54  ;;  %v1143_v56 = vadd.f32 %v1505_v55, %v2043_v18 }
 0x220   : > { %v958_v57 = vpop.f32.mrf.mxu1 }
 0x221   : > { %1175 = vst [vmem:[%s2046_s17 + $0x98] sm:$0xff] %v1143_v56  ;;  %v1141_v58 = vadd.f32 %v2043_v18, %v958_v57 }
 0x222   : > { %v1508_v59 = vpop.f32.mrf.mxu1 }
 0x223   : > { %1173 = vst [vmem:[%s2046_s17 + $0x88] sm:$0xff] %v1141_v58  ;;  %v1146_v60 = vadd.f32 %v1508_v59, %v2043_v18 }
 0x224   : > { %v971_v61 = vpop.f32.mrf.mxu1 }
 0x225   : > { %1178 = vst [vmem:[%s2046_s17 + $0xb0] sm:$0xff] %v1146_v60  ;;  %v1144_v62 = vadd.f32 %v2043_v18, %v971_v61 }
 0x226   : > { %v1509_v63 = vpop.f32.mrf.mxu1 }
 0x227   : > { %1176 = vst [vmem:[%s2046_s17 + $0xa0] sm:$0xff] %v1144_v62  ;;  %v1147_v0 = vadd.f32 %v1509_v63, %v2043_v18 }
 0x228   : > { %v974_v1 = vpop.f32.mrf.mxu1 }
 0x229   : > { %1179 = vst [vmem:[%s2046_s17 + $0xb8] sm:$0xff] %v1147_v0  ;;  %v1145_v2 = vadd.f32 %v2043_v18, %v974_v1 }
 0x22a   : > { %v1512_v3 = vpop.f32.mrf.mxu1 }
 0x22b   : > { %1177 = vst [vmem:[%s2046_s17 + $0xa8] sm:$0xff] %v1145_v2  ;;  %v1150_v4 = vadd.f32 %v1512_v3, %v2043_v18 }
 0x22c   : > { %v987_v5 = vpop.f32.mrf.mxu1 }
 0x22d   : > { %1182 = vst [vmem:[%s2046_s17 + $0xd0] sm:$0xff] %v1150_v4  ;;  %v1148_v6 = vadd.f32 %v2043_v18, %v987_v5 }
 0x22e   : > { %v1513_v7 = vpop.f32.mrf.mxu1 }
 0x22f   : > { %1180 = vst [vmem:[%s2046_s17 + $0xc0] sm:$0xff] %v1148_v6  ;;  %v1151_v8 = vadd.f32 %v1513_v7, %v2043_v18 }
 0x230   : > { %v990_v9 = vpop.f32.mrf.mxu1 }
 0x231   : > { %1183 = vst [vmem:[%s2046_s17 + $0xd8] sm:$0xff] %v1151_v8  ;;  %v1149_v10 = vadd.f32 %v2043_v18, %v990_v9 }
 0x232   : > { %v1516_v11 = vpop.f32.mrf.mxu1 }
 0x233   : > { %1181 = vst [vmem:[%s2046_s17 + $0xc8] sm:$0xff] %v1149_v10  ;;  %v1154_v12 = vadd.f32 %v1516_v11, %v2043_v18 }
 0x234   : > { %v1003_v13 = vpop.f32.mrf.mxu1 }
 0x235   : > { %1186 = vst [vmem:[%s2046_s17 + $0xf0] sm:$0xff] %v1154_v12  ;;  %v1152_v14 = vadd.f32 %v2043_v18, %v1003_v13 }
 0x236   : > { %v1517_v15 = vpop.f32.mrf.mxu1 }
 0x237   : > { %1184 = vst [vmem:[%s2046_s17 + $0xe0] sm:$0xff] %v1152_v14  ;;  %v1155_v16 = vadd.f32 %v1517_v15, %v2043_v18 }
 0x238   : > { %v1006_v17 = vpop.f32.mrf.mxu1 }
 0x239   : > { %1187 = vst [vmem:[%s2046_s17 + $0xf8] sm:$0xff] %v1155_v16  ;;  %v1153_v19 = vadd.f32 %v2043_v18, %v1006_v17 }
 0x23b   : > { %1185 = vst [vmem:[%s2046_s17 + $0xe8] sm:$0xff] %v1153_v19 }
 0x23c   : > { %1730 = shalt.err (!%p1727_p2)
}
 0x23d   : > { %s1731_s26 = scalar_lea.hbm %s2113_s10, 4096  ;;  %s1735_s12 = scalar_lea.hbm %s2171_s5, 8192 }
 0x23e   : > { %p1732_p9 = scmp.ne.s32.totalorder %s2113_s10, %s1731_s26  ;;  %p1736_p0 = scmp.lt.s32.totalorder %s2113_s10, %s2171_s5 }
 0x23f   : > { %p1737_p7 = scmp.lt.s32.totalorder %s1735_s12, %s1731_s26 }
 0x240   : > { %p1733_p12 = pnand %p1732_p9, %p1942_p3 }
 0x241   : > { %p1738_p5 = por %p1737_p7, %p1736_p0 }
 0x242   : > { %p1734_p13 = pneg %p1733_p12 }
 0x244   : > { %p1739_p1 = pnand %p1738_p5, %p1734_p13 }
 0x246   : > { %1742 = shalt.err (!%p1739_p1)
}
 0x247   : > { %s1809_s27 = smov 128   ;;  %s1810_s6 = smov 8  }
 0x248   : > { %1528 = dma.vmem_to_hbm [thread:$0]  (%p1942_p3), %s2115_s8, 4096, %s2113_s10, %s1189_s21, %s1809_s27, %s1809_s27, %s1810_s6  }
 0x249 PF: > { %s1217_s11 = sand.u32 1, %s1781_s18   ;;  %p2186_p4 = scmp.ne.s32.totalorder %s2178_s29, 0 }
 0x24a   : > { %p2187_p6 = scmp.ge.s32.totalorder %s1801_s23, 2  ;;  %s1218_s15 = scalar_lea.sflag [#allocation5], %s1217_s11 }
 0x24c   : > { %p1542_p8 = pnand %p2187_p6, %p2186_p4 }
 0x24e   : > { %p1543_p10 = pneg %p1542_p8 }
 0x250   : > { %1776 = dma.done.wait (%p1543_p10), %s1218_s15, 4096  }
 0x251   : > { %1778 = vsyncadd (%p1543_p10), %s1218_s15, 4294963200  ;;  %s22_s23 = sadd.s32 1, %s1801_s23   ;;  %s2188_s18 = smov %s1785_s19 }
 0x252   : > { %p19_p11 = scmp.ge.s32.totalorder %s22_s23, 4   ;;  %s2189_s19 = smov %s1789_s20 }
 0x253   : > { %s2190_s20 = smov %s1951_s14  ;;  %s2191_s21 = smov %s1797_s22 }
 0x254   : > { %s2192_s22 = smov %s2194_s25  ;;  %21 = sbr.rel (!%p19_p11) target bundleno = 9 (0x9), region = 106 }
 0x259   :  { %1223 = vsyncpa [#allocation4], 1 }
 0x25a   :  { %1225 = vsyncpa [#allocation4 + $0x1], 1 }
 0x25b   :  { %1226 = vsyncpa [#allocation7], 1 }
 0x25c   :  { %1227 = vsyncpa [#allocation5], 1 }
 0x25d   :  { %1229 = vsyncpa [#allocation5 + $0x1], 1 }

// kernel: tpu_custom_call.1
= control target key start
LH: loop header
LB: loop body
LE: loop exit
PB: predicated region body
PF: predicated region fallthrough
CT: control target
= control target key end

     0   :  { %s2166_s0 = inlined_call_operand.hbm [shape: bf16[512,128], index: 0, kind: input, shape index: {}]   ;;  %s2167_s1 = inlined_call_operand.hbm [shape: bf16[128,128], index: 1, kind: input, shape index: {}]   ;;  %s2168_s2 = inlined_call_operand.vmem [shape: f32[1,128], index: 2, kind: input, shape index: {}]   ;;  %s2169_s3 = inlined_call_operand.hbm [shape: bf16[128,128], index: 3, kind: input, shape index: {}]   ;;  %s2170_s4 = inlined_call_operand.vmem [shape: f32[1,128], index: 4, kind: input, shape index: {}]   ;;  %s2171_s5 = inlined_call_operand.hbm [shape: f32[512,128], index: 5, kind: output, shape index: {}]  }
   0x1   :  { %2174 = sst [smem:[#allocation13_spill]] %s2167_s1 }
   0x2   :  { %10 = vsyncpa [#allocation4], 0 }
   0x3   :  { %12 = vsyncpa [#allocation4 + $0x1], 0 }
   0x4   :  { %13 = vsyncpa [#allocation7], 0 }
   0x5   :  { %14 = vsyncpa [#allocation5], 0 }
   0x6   :  { %16 = vsyncpa [#allocation5 + $0x1], 0  ;;  %s1841_s18 = smov 0   ;;  %s1843_s19 = smov 0  }
   0x7   :  { %s1845_s20 = smov 0   ;;  %s1847_s21 = smov 0  }
   0x8   :  { %s1849_s22 = smov 0   ;;  %s1851_s23 = smov 0  }
   0x9 LB: > { %s1318_s24 = sadd.s32 4294967295, %s1801_s23   ;;  %s1319_s25 = sadd.s32 4294967294, %s1801_s23   ;;  %s1801_s23 = sphi %s1851_s23, %s22_s23   ;;  %s1797_s22 = sphi %s1849_s22, %s2192_s22   ;;  %s1793_s21 = sphi %s1847_s21, %s2191_s21   ;;  %s1789_s20 = sphi %s1845_s20, %s2190_s20   ;;  %s1785_s19 = sphi %s1843_s19, %s2189_s19   ;;  %s1781_s18 = sphi %s1841_s18, %s2188_s18  }
   0xa   : > { %p54_p0 = scmp.ne.s32.totalorder %s1785_s19, %s1781_s18  ;;  %p1875_p1 = scmp.eq.s32.totalorder %s1318_s24, 0 }
   0xb   : > { %p1879_p2 = scmp.eq.s32.totalorder %s1318_s24, 1  ;;  %p183_p3 = scmp.eq.s32.totalorder %s1319_s25, 1 }
   0xc   : > { %p1885_p4 = por %p1875_p1, %p54_p0  ;;  %p1320_p5 = scmp.ge.s32.totalorder %s1801_s23, 1 }
   0xd   : > { %p1890_p6 = por %p183_p3, %p54_p0  ;;  %p190_p7 = scmp.lt.s32.totalorder %s1801_s23, 3 }
   0xe   : > { %s1803_s6 = smov [#allocation6]   ;;  %s1804_s9 = smov [#allocation8]  }
   0xf   : > { %s2178_s29 = scalar_select %p1890_p6, 1, 0 }
  0x10   : > { %p1895_p8 = pnand %p1320_p5, %p190_p7  ;;  %s204_s7 = sshll.u32 %s1803_s6, 4  ;;  %s205_s7 = int_to_ptr.vmem [resolvable:$true] %s204_s7 }
  0x11   : > { %s226_s10 = sshll.u32 %s1804_s9, 4  ;;  %s1648_s11 = scalar_lea.vmem %s205_s7, 1024  ;;  %s227_s10 = int_to_ptr.vmem [resolvable:$true] %s226_s10 }
  0x12   : > { %p1530_p9 = pneg %p1895_p8  ;;  %p1649_p13 = scmp.ne.s32.totalorder %s205_s7, %s1648_s11 }
  0x13   : > { %p1656_p5 = scmp.lt.s32.totalorder %s205_s7, %s205_s7  ;;  %p1657_p7 = scmp.lt.s32.totalorder %s1648_s11, %s1648_s11 }
  0x14   : > { %p1904_p11 = pnand %p1530_p9, %p1875_p1 }
  0x15   : > { %p1658_p10 = por %p1657_p7, %p1656_p5 }
  0x16   : > { %p1639_p12 = pneg %p1904_p11 }
  0x18   : > { %p1651_p0 = pnand %p1649_p13, %p1639_p12 }
  0x1a   : > { %p1652_p3 = pneg %p1651_p0 }
  0x1c   : > { %p1659_p9 = pnand %p1658_p10, %p1652_p3 }
  0x1e   : > { %1662 = shalt.err (!%p1659_p9)
}
  0x1f   : > { %s2172_s12 = smov 64   ;;  %s2173_s13 = smov 4  }
  0x20   : > { %s2181_s1 = sld [smem:[#allocation13_spill]]  ;;  %s1674_s16 = scalar_lea.vmem %s227_s10, 1024 }
  0x21   : > { %p1675_p13 = scmp.ne.s32.totalorder %s227_s10, %s1674_s16  ;;  %p1682_p10 = scmp.lt.s32.totalorder %s227_s10, %s227_s10 }
  0x22   : > { %p1683_p3 = scmp.lt.s32.totalorder %s1674_s16, %s1674_s16 }
  0x23   : > { %p1677_p0 = pnand %p1675_p13, %p1639_p12 }
  0x24   : > { %p1684_p7 = por %p1683_p3, %p1682_p10 }
  0x25   : > { %p1678_p5 = pneg %p1677_p0 }
  0x26   : > { %1533 = dma.hbm_to_vmem [thread:$0]  (!%p1904_p11), %s2181_s1, 1024, %s205_s7, [#allocation7], %s2172_s12, %s2172_s12, %s2173_s13  }
  0x27   : > { %p1685_p9 = pnand %p1684_p7, %p1678_p5 }
  0x29   : > { %1688 = shalt.err (!%p1685_p9)
}
  0x2a   : > { %1536 = dma.hbm_to_vmem [thread:$0]  (!%p1904_p11), %s2169_s3, 1024, %s227_s10, [#allocation7], %s2172_s12, %s2172_s12, %s2173_s13  }
  0x2b   : > { %s34_s25 = sadd.s32 1, %s1797_s22  ;;  %s41_s6 = sadd.s32 1, %s1789_s20 }
  0x2c   : > { %p36_p12 = scmp.ge.s32.totalorder %s34_s25, 2  ;;  %p48_p13 = scmp.ne.s32.totalorder %s1789_s20, %s1785_s19 }
  0x2d   : > { %p49_p0 = scmp.eq.s32.totalorder %s1801_s23, 0  ;;  %p1547_p5 = scmp.lt.s32.totalorder %s1801_s23, 2 }
  0x2e   : > { %s2194_s25 = smov (%p36_p12, %s34_s25), 0  ;;  %p1942_p3 = por %p1879_p2, %p48_p13 }
  0x2f   : > { %p50_p10 = por %p49_p0, %p48_p13  ;;  %s38_s8 = ssub.s32 %s1797_s22, %s2194_s25 }
  0x30   : > { %s243_s9 = sand.u32 1, %s1789_s20   ;;  %p39_p7 = scmp.eq.s32.totalorder %s38_s8, 0 }
  0x31   : > { %s1325_s10 = sshll.u32 %s243_s9, 7  ;;  %s1372_s11 = sshll.u32 %s1797_s22, 11 }
  0x32   : > { %s1951_s14 = scalar_select %p39_p7, %s1789_s20, %s41_s6  }
  0x33   : > { %s253_s17 = scalar_lea.hbm %s2166_s0, %s1372_s11  ;;  %s247_s24 = scalar_lea.vmem [#allocation3], %s1325_s10 }
  0x34   : > { %s254_s12 = sshll.u32 %s247_s24, 4  ;;  %p1958_p11 = pnand %p1547_p5, %p50_p10  ;;  %s255_s12 = int_to_ptr.vmem [resolvable:$true] %s254_s12 }
  0x35   : > { %s244_s13 = scalar_lea.sflag [#allocation4], %s243_s9  ;;  %s1702_s8 = scalar_lea.vmem %s255_s12, 2048 }
  0x36   : > { %p1691_p2 = pneg %p1958_p11  ;;  %p1703_p9 = scmp.ne.s32.totalorder %s255_s12, %s1702_s8 }
  0x37   : > { %s1807_s6 = smov [#allocation3]  }
  0x38   : > { %p1705_p12 = pnand %p1703_p9, %p1691_p2  ;;  %s1707_s1 = sshll.u32 %s1807_s6, 4  ;;  %s1708_s1 = int_to_ptr.vmem [resolvable:$false] %s1707_s1 }
  0x39   : > { %s1709_s11 = scalar_lea.vmem %s1708_s1, 4096  ;;  %p1710_p0 = scmp.lt.s32.totalorder %s255_s12, %s1708_s1 }
  0x3a   : > { %p1706_p13 = pneg %p1705_p12  ;;  %p1711_p7 = scmp.lt.s32.totalorder %s1709_s11, %s1702_s8 }
  0x3c   : > { %p1712_p6 = por %p1711_p7, %p1710_p0 }
  0x3e   : > { %p1713_p5 = pnand %p1712_p6, %p1706_p13 }
  0x40   : > { %1716 = shalt.err (!%p1713_p5)
}
  0x41   : > { %s2184_s10 = smov 4   ;;  %s2185_s15 = smov 64  }
  0x42   : > { %1540 = dma.hbm_to_vmem [thread:$0]  (!%p1958_p11), %s253_s17, 2048, %s255_s12, %s244_s13, %s2185_s15, %s2185_s15, %s2184_s10  }
  0x43   : > { %266 = sbr.rel (%p1895_p8) target bundleno = 585 (0x249), region = 40  ;;  %s1972_s9 = sand.u32 (!%p1895_p8), 1, %s1785_s19  }
  0x44   : > { %s1329_s1 = sshll.u32 (!%p1895_p8), %s1972_s9, 7  ;;  %s269_s16 = scalar_lea.sflag (!%p1895_p8), [#allocation4], %s1972_s9 }
  0x45   : > { %s1976_s24 = scalar_lea.vmem (!%p1895_p8), [#allocation3], %s1329_s1 }
  0x48   : > { %1768 = dma.done.wait (%p1885_p4), %s269_s16, 2048  }
  0x49   : > { %1770 = vsyncadd (%p1885_p4), %s269_s16, 4294965248 }
  0x4a   : > { %1772 = dma.done.wait (%p1875_p1), [#allocation7], 2048  }
  0x4b   : > { %1774 = vsyncadd (%p1875_p1), [#allocation7], 4294965248  ;;  %v1605_v0 = vld [vmem:[#allocation6 + $0x38] sm:$0xff]   ;;  %v1606_v1 = vld [vmem:[#allocation6 + $0x30] sm:$0xff]   ;;  %s1332_s30 = sshll.u32 %s1972_s9, 8  ;;  %s1373_s27 = sshll.u32 %s1793_s21, 12 }
  0x4c   : > { %1422 = vmatprep.subr.bf16.mxu0 %v1605_v0  ;;  %v1607_v2 = vld [vmem:[#allocation6 + $0x28] sm:$0xff]   ;;  %v1608_v3 = vld [vmem:[#allocation6 + $0x20] sm:$0xff]   ;;  %v1609_v5 = vld [vmem:[#allocation6 + $0x18] sm:$0xff]   ;;  %s2046_s17 = scalar_lea.vmem [#allocation9], %s1332_s30  ;;  %s2113_s10 = scalar_lea.hbm %s2171_s5, %s1373_s27 }
  0x4d   : > { %1423 = vmatpush3.bf16.msra.mxu0 %v1605_v0  ;;  %v1613_v4 = vld [vmem:[%s1976_s24] sm:$0xff]   ;;  %v1610_v6 = vld [vmem:[#allocation6 + $0x10] sm:$0xff]   ;;  %v1611_v7 = vld [vmem:[#allocation6 + $0x8] sm:$0xff]   ;;  %s1202_s8 = sshll.u32 %s2046_s17, 4  ;;  %s1189_s21 = scalar_lea.sflag [#allocation5], %s1972_s9  ;;  %s2115_s8 = int_to_ptr.vmem [resolvable:$true] %s1202_s8 }
  0x4e   : > { %1424 = vmatprep.subr.bf16.mxu0 %v1606_v1  ;;  %1438 = vmatprep.mubr.bf16.mxu0 %v1613_v4  ;;  %v1612_v8 = vld [vmem:[#allocation6] sm:$0xff]   ;;  %v1629_v9 = vld [vmem:[#allocation8 + $0x38] sm:$0xff]   ;;  %v1630_v10 = vld [vmem:[#allocation8 + $0x30] sm:$0xff]   ;;  %s1717_s15 = scalar_lea.vmem %s2115_s8, 4096  ;;  %s1808_s1 = smov [#allocation9]  }
  0x4f   : > { %1470 = vmatprep.subr.bf16.mxu1 %v1629_v9  ;;  %v1614_v11 = vld [vmem:[%s1976_s24 + $0x8] sm:$0xff]   ;;  %v1615_v13 = vld [vmem:[%s1976_s24 + $0x10] sm:$0xff]   ;;  %v1632_v14 = vld [vmem:[#allocation8 + $0x20] sm:$0xff]   ;;  %p1718_p1 = scmp.ne.s32.totalorder %s2115_s8, %s1717_s15  ;;  %s1721_s16 = sshll.u32 %s1808_s1, 4  ;;  %s1722_s16 = int_to_ptr.vmem [resolvable:$false] %s1721_s16 }
  0x50   : > { %1471 = vmatpush3.bf16.msra.mxu1 %v1629_v9  ;;  %v1631_v12 = vld [vmem:[#allocation8 + $0x28] sm:$0xff]   ;;  %v1633_v15 = vld [vmem:[#allocation8 + $0x18] sm:$0xff]   ;;  %v1617_v17 = vld [vmem:[%s1976_s24 + $0x20] sm:$0xff]   ;;  %p1724_p8 = scmp.lt.s32.totalorder %s2115_s8, %s1722_s16 }
  0x51   : > { %1425 = vmatpush3.bf16.msra.mxu0 %v1606_v1  ;;  %1472 = vmatprep.subr.bf16.mxu1 %v1630_v10  ;;  %v1616_v16 = vld [vmem:[%s1976_s24 + $0x18] sm:$0xff]   ;;  %v1618_v18 = vld [vmem:[%s1976_s24 + $0x28] sm:$0xff]   ;;  %v1619_v19 = vld [vmem:[%s1976_s24 + $0x30] sm:$0xff]   ;;  %p1719_p4 = pnand %p1718_p1, %p1942_p3 }
  0x52   : > { %1426 = vmatprep.subr.bf16.mxu0 %v1607_v2  ;;  %v1620_v20 = vld [vmem:[%s1976_s24 + $0x38] sm:$0xff]   ;;  %v1621_v21 = vld [vmem:[%s1976_s24 + $0x40] sm:$0xff]   ;;  %v1622_v22 = vld [vmem:[%s1976_s24 + $0x48] sm:$0xff]  }
  0x53   : > { %v1623_v23 = vld [vmem:[%s1976_s24 + $0x50] sm:$0xff]   ;;  %v1624_v24 = vld [vmem:[%s1976_s24 + $0x58] sm:$0xff]   ;;  %v1625_v25 = vld [vmem:[%s1976_s24 + $0x60] sm:$0xff]   ;;  %p1720_p6 = pneg %p1719_p4 }
  0x54   : > { %1473 = vmatpush3.bf16.msra.mxu1 %v1630_v10  ;;  %v1626_v26 = vld [vmem:[%s1976_s24 + $0x68] sm:$0xff]   ;;  %v1627_v27 = vld [vmem:[%s1976_s24 + $0x70] sm:$0xff]   ;;  %v1628_v28 = vld [vmem:[%s1976_s24 + $0x78] sm:$0xff]   ;;  %s1723_s24 = scalar_lea.vmem %s1722_s16, 8192 }
  0x55   : > { %1427 = vmatpush3.bf16.msra.mxu0 %v1607_v2  ;;  %1474 = vmatprep.subr.bf16.mxu1 %v1631_v12  ;;  %v1634_v29 = vld [vmem:[#allocation8 + $0x10] sm:$0xff]   ;;  %v1635_v30 = vld [vmem:[#allocation8 + $0x8] sm:$0xff]   ;;  %v1636_v31 = vld [vmem:[#allocation8] sm:$0xff]   ;;  %p1725_p10 = scmp.lt.s32.totalorder %s1723_s24, %s1717_s15 }
  0x56   : > { %1428 = vmatprep.subr.bf16.mxu0 %v1608_v3  ;;  %v2005_v34 = vld [vmem:[%s2168_s2] ss:$0 sm:$0xff] }
  0x57   : > { %p1726_p11 = por %p1725_p10, %p1724_p8 }
  0x58   : > { %1475 = vmatpush3.bf16.msra.mxu1 %v1631_v12 }
  0x59   : > { %1429 = vmatpush3.bf16.msra.mxu0 %v1608_v3  ;;  %1476 = vmatprep.subr.bf16.mxu1 %v1632_v14  ;;  %p1727_p2 = pnand %p1726_p11, %p1720_p6 }
  0x5a   : > { %1430 = vmatprep.subr.bf16.mxu0 %v1609_v5 }
  0x5c   : > { %1477 = vmatpush3.bf16.msra.mxu1 %v1632_v14 }
  0x5d   : > { %1431 = vmatpush3.bf16.msra.mxu0 %v1609_v5  ;;  %1478 = vmatprep.subr.bf16.mxu1 %v1633_v15 }
  0x5e   : > { %1432 = vmatprep.subr.bf16.mxu0 %v1610_v6 }
  0x60   : > { %1479 = vmatpush3.bf16.msra.mxu1 %v1633_v15 }
  0x61   : > { %1433 = vmatpush3.bf16.msra.mxu0 %v1610_v6  ;;  %1480 = vmatprep.subr.bf16.mxu1 %v1634_v29 }
  0x62   : > { %1434 = vmatprep.subr.bf16.mxu0 %v1611_v7 }
  0x64   : > { %1481 = vmatpush3.bf16.msra.mxu1 %v1634_v29 }
  0x65   : > { %1435 = vmatpush3.bf16.msra.mxu0 %v1611_v7  ;;  %1482 = vmatprep.subr.bf16.mxu1 %v1635_v30 }
  0x66   : > { %1436 = vmatprep.subr.bf16.mxu0 %v1612_v8 }
  0x68   : > { %1483 = vmatpush3.bf16.msra.mxu1 %v1635_v30 }
  0x69   : > { %1437 = vmatpush3.bf16.msra.mxu0 %v1612_v8  ;;  %1484 = vmatprep.subr.bf16.mxu1 %v1636_v31 }
  0x6c   : > { %1439 = vmatmul.mubr.bf16.vlgmr.msra.gmra.mxu0 %v1614_v11  ;;  %1485 = vmatpush3.bf16.msra.mxu1 %v1636_v31 }
  0x6d   : > { %1442 = vmatprep.mubr.bf16.mxu0 %v1615_v13 }
  0x74   : > { %1443 = vmatmul.mubr.bf16.gmra.mxu0 %v1616_v16 }
  0x75   : > { %1446 = vmatprep.mubr.bf16.mxu0 %v1617_v17 }
  0x7c   : > { %1447 = vmatmul.mubr.bf16.gmra.mxu0 %v1618_v18 }
  0x7d   : > { %1450 = vmatprep.mubr.bf16.mxu0 %v1619_v19 }
  0x84   : > { %1451 = vmatmul.mubr.bf16.gmra.mxu0 %v1620_v20 }
  0x85   : > { %1454 = vmatprep.mubr.bf16.mxu0 %v1621_v21 }
  0x8c   : > { %1455 = vmatmul.mubr.bf16.gmra.mxu0 %v1622_v22 }
  0x8d   : > { %1458 = vmatprep.mubr.bf16.mxu0 %v1623_v23 }
  0x94   : > { %1459 = vmatmul.mubr.bf16.gmra.mxu0 %v1624_v24 }
  0x95   : > { %1462 = vmatprep.mubr.bf16.mxu0 %v1625_v25 }
  0x9c   : > { %1463 = vmatmul.mubr.bf16.gmra.mxu0 %v1626_v26 }
  0x9d   : > { %1466 = vmatprep.mubr.bf16.mxu0 %v1627_v27 }
  0xa4   : > { %1467 = vmatmul.mubr.bf16.gmra.mxu0 %v1628_v28 }
 0x12c   : > { %v1440_v32 = vpop.f32.mrf.mxu0 }
 0x12d   : > { %v595_v38 = vadd.f32 %v1440_v32, %v2005_v34 }
 0x12e   : > { %v586_v33 = vpop.f32.mrf.mxu0 }
 0x12f   : > { %v587_v36 = vadd.f32 %v2005_v34, %v586_v33  ;;  %v715_v45 = vmax.f32 %v595_v38, 0.0 }
 0x130   : > { %v1441_v35 = vpop.f32.mrf.mxu0 }
 0x131   : > { %v598_v37 = vadd.f32 %v1441_v35, %v2005_v34  ;;  %v713_v43 = vmax.f32 %v587_v36, 0.0 }
 0x132   : > { %v589_v39 = vpop.f32.mrf.mxu0 }
 0x133   : > { %v590_v40 = vadd.f32 %v2005_v34, %v589_v39  ;;  %v716_v41 = vmax.f32 %v598_v37, 0.0 }
 0x134   : > { %v1444_v42 = vpop.f32.mrf.mxu0 }
 0x135   : > { %v714_v44 = vmax.f32 %v590_v40, 0.0  ;;  %v778_v48 = vpack.c.bf16 %v716_v41, %v715_v45  ;;  %v611_v52 = vadd.f32 %v1444_v42, %v2005_v34 }
 0x136   : > { %v602_v46 = vpop.f32.mrf.mxu0 }
 0x137   : > { %v777_v47 = vpack.c.bf16 %v714_v44, %v713_v43  ;;  %v603_v50 = vadd.f32 %v2005_v34, %v602_v46  ;;  %v719_v59 = vmax.f32 %v611_v52, 0.0 }
 0x138   : > { %v1445_v49 = vpop.f32.mrf.mxu0 }
 0x139   : > { %v614_v51 = vadd.f32 %v1445_v49, %v2005_v34  ;;  %1486 = vmatprep.mubr.bf16.mxu1 %v777_v47  ;;  %v717_v57 = vmax.f32 %v603_v50, 0.0 }
 0x13a   : > { %v605_v53 = vpop.f32.mrf.mxu0  ;;  %1487 = vmatmul.mubr.bf16.vlgmr.msra.gmra.mxu1 %v778_v48 }
 0x13b   : > { %v606_v54 = vadd.f32 %v2005_v34, %v605_v53  ;;  %v720_v55 = vmax.f32 %v614_v51, 0.0 }
 0x13c   : > { %v1448_v56 = vpop.f32.mrf.mxu0 }
 0x13d   : > { %v718_v58 = vmax.f32 %v606_v54, 0.0  ;;  %v780_v62 = vpack.c.bf16 %v720_v55, %v719_v59  ;;  %v627_v2 = vadd.f32 %v1448_v56, %v2005_v34 }
 0x13e   : > { %v618_v60 = vpop.f32.mrf.mxu0 }
 0x13f   : > { %v779_v61 = vpack.c.bf16 %v718_v58, %v717_v57  ;;  %v619_v0 = vadd.f32 %v2005_v34, %v618_v60  ;;  %v723_v9 = vmax.f32 %v627_v2, 0.0 }
 0x140   : > { %v1449_v63 = vpop.f32.mrf.mxu0 }
 0x141   : > { %v630_v1 = vadd.f32 %v1449_v63, %v2005_v34  ;;  %1490 = vmatprep.mubr.bf16.mxu1 %v779_v61  ;;  %v721_v7 = vmax.f32 %v619_v0, 0.0 }
 0x142   : > { %v621_v3 = vpop.f32.mrf.mxu0  ;;  %1491 = vmatmul.mubr.bf16.gmra.mxu1 %v780_v62 }
 0x143   : > { %v622_v4 = vadd.f32 %v2005_v34, %v621_v3  ;;  %v724_v5 = vmax.f32 %v630_v1, 0.0 }
 0x144   : > { %v1452_v6 = vpop.f32.mrf.mxu0 }
 0x145   : > { %v722_v8 = vmax.f32 %v622_v4, 0.0  ;;  %v782_v12 = vpack.c.bf16 %v724_v5, %v723_v9  ;;  %v643_v16 = vadd.f32 %v1452_v6, %v2005_v34 }
 0x146   : > { %v634_v10 = vpop.f32.mrf.mxu0 }
 0x147   : > { %v781_v11 = vpack.c.bf16 %v722_v8, %v721_v7  ;;  %v635_v14 = vadd.f32 %v2005_v34, %v634_v10  ;;  %v727_v23 = vmax.f32 %v643_v16, 0.0 }
 0x148   : > { %v1453_v13 = vpop.f32.mrf.mxu0 }
 0x149   : > { %v646_v15 = vadd.f32 %v1453_v13, %v2005_v34  ;;  %1494 = vmatprep.mubr.bf16.mxu1 %v781_v11  ;;  %v725_v21 = vmax.f32 %v635_v14, 0.0 }
 0x14a   : > { %v637_v17 = vpop.f32.mrf.mxu0  ;;  %1495 = vmatmul.mubr.bf16.gmra.mxu1 %v782_v12 }
 0x14b   : > { %v638_v18 = vadd.f32 %v2005_v34, %v637_v17  ;;  %v728_v19 = vmax.f32 %v646_v15, 0.0 }
 0x14c   : > { %v1456_v20 = vpop.f32.mrf.mxu0 }
 0x14d   : > { %v726_v22 = vmax.f32 %v638_v18, 0.0  ;;  %v784_v26 = vpack.c.bf16 %v728_v19, %v727_v23  ;;  %v659_v30 = vadd.f32 %v1456_v20, %v2005_v34  ;;  %v2043_v18 = vld [vmem:[%s2170_s4] ss:$0 sm:$0xff] }
 0x14e   : > { %v650_v24 = vpop.f32.mrf.mxu0 }
 0x14f   : > { %v783_v25 = vpack.c.bf16 %v726_v22, %v725_v21  ;;  %v651_v28 = vadd.f32 %v2005_v34, %v650_v24  ;;  %v731_v38 = vmax.f32 %v659_v30, 0.0 }
 0x150   : > { %v1457_v27 = vpop.f32.mrf.mxu0 }
 0x151   : > { %v662_v29 = vadd.f32 %v1457_v27, %v2005_v34  ;;  %1498 = vmatprep.mubr.bf16.mxu1 %v783_v25  ;;  %v729_v36 = vmax.f32 %v651_v28, 0.0 }
 0x152   : > { %v653_v31 = vpop.f32.mrf.mxu0  ;;  %1499 = vmatmul.mubr.bf16.gmra.mxu1 %v784_v26 }
 0x153   : > { %v654_v32 = vadd.f32 %v2005_v34, %v653_v31  ;;  %v732_v33 = vmax.f32 %v662_v29, 0.0 }
 0x154   : > { %v1460_v35 = vpop.f32.mrf.mxu0 }
 0x155   : > { %v730_v37 = vmax.f32 %v654_v32, 0.0  ;;  %v786_v41 = vpack.c.bf16 %v732_v33, %v731_v38  ;;  %v675_v45 = vadd.f32 %v1460_v35, %v2005_v34 }
 0x156   : > { %v666_v39 = vpop.f32.mrf.mxu0 }
 0x157   : > { %v785_v40 = vpack.c.bf16 %v730_v37, %v729_v36  ;;  %v667_v43 = vadd.f32 %v2005_v34, %v666_v39  ;;  %v735_v52 = vmax.f32 %v675_v45, 0.0 }
 0x158   : > { %v1461_v42 = vpop.f32.mrf.mxu0 }
 0x159   : > { %v678_v44 = vadd.f32 %v1461_v42, %v2005_v34  ;;  %1502 = vmatprep.mubr.bf16.mxu1 %v785_v40  ;;  %v733_v50 = vmax.f32 %v667_v43, 0.0 }
 0x15a   : > { %v669_v46 = vpop.f32.mrf.mxu0  ;;  %1503 = vmatmul.mubr.bf16.gmra.mxu1 %v786_v41 }
 0x15b   : > { %v670_v47 = vadd.f32 %v2005_v34, %v669_v46  ;;  %v736_v48 = vmax.f32 %v678_v44, 0.0 }
 0x15c   : > { %v1464_v49 = vpop.f32.mrf.mxu0 }
 0x15d   : > { %v734_v51 = vmax.f32 %v670_v47, 0.0  ;;  %v788_v55 = vpack.c.bf16 %v736_v48, %v735_v52  ;;  %v691_v59 = vadd.f32 %v1464_v49, %v2005_v34 }
 0x15e   : > { %v682_v53 = vpop.f32.mrf.mxu0 }
 0x15f   : > { %v787_v54 = vpack.c.bf16 %v734_v51, %v733_v50  ;;  %v683_v57 = vadd.f32 %v2005_v34, %v682_v53  ;;  %v739_v2 = vmax.f32 %v691_v59, 0.0 }
 0x160   : > { %v1465_v56 = vpop.f32.mrf.mxu0 }
 0x161   : > { %v694_v58 = vadd.f32 %v1465_v56, %v2005_v34  ;;  %1506 = vmatprep.mubr.bf16.mxu1 %v787_v54  ;;  %v737_v0 = vmax.f32 %v683_v57, 0.0 }
 0x162   : > { %v685_v60 = vpop.f32.mrf.mxu0  ;;  %1507 = vmatmul.mubr.bf16.gmra.mxu1 %v788_v55 }
 0x163   : > { %v686_v61 = vadd.f32 %v2005_v34, %v685_v60  ;;  %v740_v62 = vmax.f32 %v694_v58, 0.0 }
 0x164   : > { %v1468_v63 = vpop.f32.mrf.mxu0 }
 0x165   : > { %v738_v1 = vmax.f32 %v686_v61, 0.0  ;;  %v790_v5 = vpack.c.bf16 %v740_v62, %v739_v2  ;;  %v707_v9 = vadd.f32 %v1468_v63, %v2005_v34 }
 0x166   : > { %v698_v3 = vpop.f32.mrf.mxu0 }
 0x167   : > { %v789_v4 = vpack.c.bf16 %v738_v1, %v737_v0  ;;  %v699_v7 = vadd.f32 %v2005_v34, %v698_v3  ;;  %v743_v15 = vmax.f32 %v707_v9, 0.0 }
 0x168   : > { %v1469_v6 = vpop.f32.mrf.mxu0 }
 0x169   : > { %v710_v8 = vadd.f32 %v1469_v6, %v2005_v34  ;;  %1510 = vmatprep.mubr.bf16.mxu1 %v789_v4  ;;  %v741_v13 = vmax.f32 %v699_v7, 0.0 }
 0x16a   : > { %v701_v10 = vpop.f32.mrf.mxu0  ;;  %1511 = vmatmul.mubr.bf16.gmra.mxu1 %v790_v5 }
 0x16b   : > { %v702_v11 = vadd.f32 %v2005_v34, %v701_v10  ;;  %v744_v12 = vmax.f32 %v710_v8, 0.0 }
 0x16d   : > { %v742_v14 = vmax.f32 %v702_v11, 0.0  ;;  %v792_v17 = vpack.c.bf16 %v744_v12, %v743_v15 }
 0x16f   : > { %v791_v16 = vpack.c.bf16 %v742_v14, %v741_v13 }
 0x171   : > { %1514 = vmatprep.mubr.bf16.mxu1 %v791_v16 }
 0x172   : > { %1515 = vmatmul.mubr.bf16.gmra.mxu1 %v792_v17 }
 0x1fa   : > { %v1488_v19 = vpop.f32.mrf.mxu1 }
 0x1fb   : > { %v1126_v20 = vadd.f32 %v1488_v19, %v2043_v18 }
 0x1fc   : > { %v891_v21 = vpop.f32.mrf.mxu1 }
 0x1fd   : > { %1158 = vst [vmem:[%s2046_s17 + $0x10] sm:$0xff] %v1126_v20  ;;  %v1124_v34 = vadd.f32 %v2043_v18, %v891_v21 }
 0x1fe   : > { %v1489_v22 = vpop.f32.mrf.mxu1 }
 0x1ff   : > { %1156 = vst [vmem:[%s2046_s17] sm:$0xff] %v1124_v34  ;;  %v1127_v23 = vadd.f32 %v1489_v22, %v2043_v18 }
 0x200   : > { %v894_v24 = vpop.f32.mrf.mxu1 }
 0x201   : > { %1159 = vst [vmem:[%s2046_s17 + $0x18] sm:$0xff] %v1127_v23  ;;  %v1125_v25 = vadd.f32 %v2043_v18, %v894_v24 }
 0x202   : > { %v1492_v26 = vpop.f32.mrf.mxu1 }
 0x203   : > { %1157 = vst [vmem:[%s2046_s17 + $0x8] sm:$0xff] %v1125_v25  ;;  %v1130_v27 = vadd.f32 %v1492_v26, %v2043_v18 }
 0x204   : > { %v907_v28 = vpop.f32.mrf.mxu1 }
 0x205   : > { %1162 = vst [vmem:[%s2046_s17 + $0x30] sm:$0xff] %v1130_v27  ;;  %v1128_v29 = vadd.f32 %v2043_v18, %v907_v28 }
 0x206   : > { %v1493_v30 = vpop.f32.mrf.mxu1 }
 0x207   : > { %1160 = vst [vmem:[%s2046_s17 + $0x20] sm:$0xff] %v1128_v29  ;;  %v1131_v31 = vadd.f32 %v1493_v30, %v2043_v18 }
 0x208   : > { %v910_v32 = vpop.f32.mrf.mxu1 }
 0x209   : > { %1163 = vst [vmem:[%s2046_s17 + $0x38] sm:$0xff] %v1131_v31  ;;  %v1129_v33 = vadd.f32 %v2043_v18, %v910_v32 }
 0x20a   : > { %v1496_v35 = vpop.f32.mrf.mxu1 }
 0x20b   : > { %1161 = vst [vmem:[%s2046_s17 + $0x28] sm:$0xff] %v1129_v33  ;;  %v1134_v36 = vadd.f32 %v1496_v35, %v2043_v18 }
 0x20c   : > { %v923_v37 = vpop.f32.mrf.mxu1 }
 0x20d   : > { %1166 = vst [vmem:[%s2046_s17 + $0x50] sm:$0xff] %v1134_v36  ;;  %v1132_v38 = vadd.f32 %v2043_v18, %v923_v37 }
 0x20e   : > { %v1497_v39 = vpop.f32.mrf.mxu1 }
 0x20f   : > { %1164 = vst [vmem:[%s2046_s17 + $0x40] sm:$0xff] %v1132_v38  ;;  %v1135_v40 = vadd.f32 %v1497_v39, %v2043_v18 }
 0x210   : > { %v926_v41 = vpop.f32.mrf.mxu1 }
 0x211   : > { %1167 = vst [vmem:[%s2046_s17 + $0x58] sm:$0xff] %v1135_v40  ;;  %v1133_v42 = vadd.f32 %v2043_v18, %v926_v41 }
 0x212   : > { %v1500_v43 = vpop.f32.mrf.mxu1 }
 0x213   : > { %1165 = vst [vmem:[%s2046_s17 + $0x48] sm:$0xff] %v1133_v42  ;;  %v1138_v44 = vadd.f32 %v1500_v43, %v2043_v18 }
 0x214   : > { %v939_v45 = vpop.f32.mrf.mxu1 }
 0x215   : > { %1170 = vst [vmem:[%s2046_s17 + $0x70] sm:$0xff] %v1138_v44  ;;  %v1136_v46 = vadd.f32 %v2043_v18, %v939_v45 }
 0x216   : > { %v1501_v47 = vpop.f32.mrf.mxu1 }
 0x217   : > { %1168 = vst [vmem:[%s2046_s17 + $0x60] sm:$0xff] %v1136_v46  ;;  %v1139_v48 = vadd.f32 %v1501_v47, %v2043_v18 }
 0x218   : > { %v942_v49 = vpop.f32.mrf.mxu1 }
 0x219   : > { %1171 = vst [vmem:[%s2046_s17 + $0x78] sm:$0xff] %v1139_v48  ;;  %v1137_v50 = vadd.f32 %v2043_v18, %v942_v49 }
 0x21a   : > { %v1504_v51 = vpop.f32.mrf.mxu1 }
 0x21b   : > { %1169 = vst [vmem:[%s2046_s17 + $0x68] sm:$0xff] %v1137_v50  ;;  %v1142_v52 = vadd.f32 %v1504_v51, %v2043_v18 }
 0x21c   : > { %v955_v53 = vpop.f32.mrf.mxu1 }
 0x21d   : > { %1174 = vst [vmem:[%s2046_s17 + $0x90] sm:$0xff] %v1142_v52  ;;  %v1140_v54 = vadd.f32 %v2043_v18, %v955_v53 }
 0x21e   : > { %v1505_v55 = vpop.f32.mrf.mxu1 }
 0x21f   : > { %1172 = vst [vmem:[%s2046_s17 + $0x80] sm:$0xff] %v1140_v54  ;;  %v1143_v56 = vadd.f32 %v1505_v55, %v2043_v18 }
 0x220   : > { %v958_v57 = vpop.f32.mrf.mxu1 }
 0x221   : > { %1175 = vst [vmem:[%s2046_s17 + $0x98] sm:$0xff] %v1143_v56  ;;  %v1141_v58 = vadd.f32 %v2043_v18, %v958_v57 }
 0x222   : > { %v1508_v59 = vpop.f32.mrf.mxu1 }
 0x223   : > { %1173 = vst [vmem:[%s2046_s17 + $0x88] sm:$0xff] %v1141_v58  ;;  %v1146_v60 = vadd.f32 %v1508_v59, %v2043_v18 }
 0x224   : > { %v971_v61 = vpop.f32.mrf.mxu1 }
 0x225   : > { %1178 = vst [vmem:[%s2046_s17 + $0xb0] sm:$0xff] %v1146_v60  ;;  %v1144_v62 = vadd.f32 %v2043_v18, %v971_v61 }
 0x226   : > { %v1509_v63 = vpop.f32.mrf.mxu1 }
 0x227   : > { %1176 = vst [vmem:[%s2046_s17 + $0xa0] sm:$0xff] %v1144_v62  ;;  %v1147_v0 = vadd.f32 %v1509_v63, %v2043_v18 }
 0x228   : > { %v974_v1 = vpop.f32.mrf.mxu1 }
 0x229   : > { %1179 = vst [vmem:[%s2046_s17 + $0xb8] sm:$0xff] %v1147_v0  ;;  %v1145_v2 = vadd.f32 %v2043_v18, %v974_v1 }
 0x22a   : > { %v1512_v3 = vpop.f32.mrf.mxu1 }
 0x22b   : > { %1177 = vst [vmem:[%s2046_s17 + $0xa8] sm:$0xff] %v1145_v2  ;;  %v1150_v4 = vadd.f32 %v1512_v3, %v2043_v18 }
 0x22c   : > { %v987_v5 = vpop.f32.mrf.mxu1 }
 0x22d   : > { %1182 = vst [vmem:[%s2046_s17 + $0xd0] sm:$0xff] %v1150_v4  ;;  %v1148_v6 = vadd.f32 %v2043_v18, %v987_v5 }
 0x22e   : > { %v1513_v7 = vpop.f32.mrf.mxu1 }
 0x22f   : > { %1180 = vst [vmem:[%s2046_s17 + $0xc0] sm:$0xff] %v1148_v6  ;;  %v1151_v8 = vadd.f32 %v1513_v7, %v2043_v18 }
 0x230   : > { %v990_v9 = vpop.f32.mrf.mxu1 }
 0x231   : > { %1183 = vst [vmem:[%s2046_s17 + $0xd8] sm:$0xff] %v1151_v8  ;;  %v1149_v10 = vadd.f32 %v2043_v18, %v990_v9 }
 0x232   : > { %v1516_v11 = vpop.f32.mrf.mxu1 }
 0x233   : > { %1181 = vst [vmem:[%s2046_s17 + $0xc8] sm:$0xff] %v1149_v10  ;;  %v1154_v12 = vadd.f32 %v1516_v11, %v2043_v18 }
 0x234   : > { %v1003_v13 = vpop.f32.mrf.mxu1 }
 0x235   : > { %1186 = vst [vmem:[%s2046_s17 + $0xf0] sm:$0xff] %v1154_v12  ;;  %v1152_v14 = vadd.f32 %v2043_v18, %v1003_v13 }
 0x236   : > { %v1517_v15 = vpop.f32.mrf.mxu1 }
 0x237   : > { %1184 = vst [vmem:[%s2046_s17 + $0xe0] sm:$0xff] %v1152_v14  ;;  %v1155_v16 = vadd.f32 %v1517_v15, %v2043_v18 }
 0x238   : > { %v1006_v17 = vpop.f32.mrf.mxu1 }
 0x239   : > { %1187 = vst [vmem:[%s2046_s17 + $0xf8] sm:$0xff] %v1155_v16  ;;  %v1153_v19 = vadd.f32 %v2043_v18, %v1006_v17 }
 0x23b   : > { %1185 = vst [vmem:[%s2046_s17 + $0xe8] sm:$0xff] %v1153_v19 }
 0x23c   : > { %1730 = shalt.err (!%p1727_p2)
}
 0x23d   : > { %s1731_s26 = scalar_lea.hbm %s2113_s10, 4096  ;;  %s1735_s12 = scalar_lea.hbm %s2171_s5, 8192 }
 0x23e   : > { %p1732_p9 = scmp.ne.s32.totalorder %s2113_s10, %s1731_s26  ;;  %p1736_p0 = scmp.lt.s32.totalorder %s2113_s10, %s2171_s5 }
 0x23f   : > { %p1737_p7 = scmp.lt.s32.totalorder %s1735_s12, %s1731_s26 }
 0x240   : > { %p1733_p12 = pnand %p1732_p9, %p1942_p3 }
 0x241   : > { %p1738_p5 = por %p1737_p7, %p1736_p0 }
 0x242   : > { %p1734_p13 = pneg %p1733_p12 }
 0x244   : > { %p1739_p1 = pnand %p1738_p5, %p1734_p13 }
 0x246   : > { %1742 = shalt.err (!%p1739_p1)
}
 0x247   : > { %s1809_s27 = smov 128   ;;  %s1810_s6 = smov 8  }
 0x248   : > { %1528 = dma.vmem_to_hbm [thread:$0]  (%p1942_p3), %s2115_s8, 4096, %s2113_s10, %s1189_s21, %s1809_s27, %s1809_s27, %s1810_s6  }
 0x249 PF: > { %s1217_s11 = sand.u32 1, %s1781_s18   ;;  %p2186_p4 = scmp.ne.s32.totalorder %s2178_s29, 0 }
 0x24a   : > { %p2187_p6 = scmp.ge.s32.totalorder %s1801_s23, 2  ;;  %s1218_s15 = scalar_lea.sflag [#allocation5], %s1217_s11 }
 0x24c   : > { %p1542_p8 = pnand %p2187_p6, %p2186_p4 }
 0x24e   : > { %p1543_p10 = pneg %p1542_p8 }
 0x250   : > { %1776 = dma.done.wait (%p1543_p10), %s1218_s15, 4096  }
 0x251   : > { %1778 = vsyncadd (%p1543_p10), %s1218_s15, 4294963200  ;;  %s22_s23 = sadd.s32 1, %s1801_s23   ;;  %s2188_s18 = smov %s1785_s19 }
 0x252   : > { %p19_p11 = scmp.ge.s32.totalorder %s22_s23, 4   ;;  %s2189_s19 = smov %s1789_s20 }
 0x253   : > { %s2190_s20 = smov %s1951_s14  ;;  %s2191_s21 = smov %s1797_s22 }
 0x254   : > { %s2192_s22 = smov %s2194_s25  ;;  %21 = sbr.rel (!%p19_p11) target bundleno = 9 (0x9), region = 106 }
 0x259   :  { %1223 = vsyncpa [#allocation4], 1 }
 0x25a   :  { %1225 = vsyncpa [#allocation4 + $0x1], 1 }
 0x25b   :  { %1226 = vsyncpa [#allocation7], 1 }
 0x25c   :  { %1227 = vsyncpa [#allocation5], 1 }
 0x25d   :  { %1229 = vsyncpa [#allocation5 + $0x1], 1 }

</bundles_post_ra>
